<compile_context>
chip_gen: v5e
topology: v5e:2x2
jax: 0.10.0
libtpu: 0.0.40
codegen_flags: <defaults>
</compile_context>

<pallas_src>
import functools

import jax
import jax.numpy as jnp
from jax.experimental import pallas as pl
from jax.experimental.pallas import tpu as pltpu


# ----------------------------------------------------------------------------
# Fused kernel: one grid step = one image.
#   x_ref     : (1, Cin, Mp) padded flat input,  Mp = H*W + 2*(W+1)
#   w_ref     : (Cout, 9*Cin) stacked 3x3 weights, K index = (ky*3+kx)*Cin + c
#   mask_ref  : (2, M) {0,1} masks killing left/right column-wrap taps
#   gamma_ref : (Cout, 1)   beta_ref: (Cout, 1)
#   o_ref     : (N, Cout, M + 2*out_pad) resident (revisited) output block
#   stk_ref   : (9*Cin, M) VMEM scratch holding the stacked tap operand
# ----------------------------------------------------------------------------
def _fused_conv_bn_lrelu_kernel(x_ref, w_ref, mask_ref, gamma_ref, beta_ref,
                                o_ref, stk_ref, *, H, W, Cin, N_imgs, out_pad,
                                eps):
    M = H * W
    n = pl.program_id(0)

    if out_pad:
        # Zero the resident output once so the (W+1)-wide halos of the padded
        # layout (consumed directly by the next conv) are genuine zeros.
        @pl.when(n == 0)
        def _():
            o_ref[...] = jnp.zeros_like(o_ref)

    left_ok = mask_ref[0:1, :]      # kx = 0 taps valid (output col >= 1)
    right_ok = mask_ref[1:2, :]     # kx = 2 taps valid (output col <= W-2)

    # Build the stacked (9*Cin, M) tap operand: 9 static lane-offset slices of
    # the padded flat input, with edge masks applied pre-dot.
    for t in range(9):
        ky, kx = divmod(t, 3)
        start = ky * W + kx                              # static lane offset
        src = x_ref[0, :, start:start + M]               # (Cin, M)
        if kx == 0:
            src = src * left_ok
        elif kx == 2:
            src = src * right_ok
        stk_ref[t * Cin:(t + 1) * Cin, :] = src

    # One stacked-K MXU dot replaces the previous 9 tiny (Cout,Cin) dots.
    y = jnp.dot(w_ref[...], stk_ref[...], preferred_element_type=jnp.float32)

    # Stash the raw (pre-BN) conv output of image n in the resident block.
    o_ref[n, :, out_pad:out_pad + M] = y

    # Last step: the whole batch's conv output is VMEM-resident -> compute the
    # BatchNorm training statistics (centered variance) and apply the fused
    # per-channel affine + LeakyReLU(0.01) in place.  The conv bias is a
    # per-channel constant and cancels under the mean subtraction.
    @pl.when(n == N_imgs - 1)
    def _():
        y_all = o_ref[:, :, out_pad:out_pad + M]          # (N, Cout, M)
        cnt = jnp.float32(N_imgs * M)
        s = jnp.sum(y_all, axis=0)                        # (Cout, M)
        mean = (jnp.sum(s, axis=1, keepdims=True) / cnt)[None]       # (1,C,1)
        centered = y_all - mean
        var = (jnp.sum(jnp.sum(centered * centered, axis=0),
                       axis=1, keepdims=True) / cnt)[None]           # (1,C,1)
        scale = gamma_ref[...][None] * jax.lax.rsqrt(var + eps)
        act = centered * scale + beta_ref[...][None]
        act = jnp.where(act > 0, act, 0.01 * act)
        o_ref[:, :, out_pad:out_pad + M] = act.astype(o_ref.dtype)


def conv_bn_lrelu(x_flat, w, gamma, beta, *, H, W, out_pad, eps=1e-5):
    """One fused Conv2d(3x3, pad=1) + BatchNorm2d(train) + LeakyReLU(0.01).

    x_flat: (N, Cin, Mp) flat NCHW input already zero-padded by W+1 on each
    side of the flat spatial axis (Mp = H*W + 2*(W+1)).
    Returns (N, Cout, H*W + 2*out_pad) f32; with out_pad = W+1 the result is in
    the same padded layout and can feed the next conv directly.
    """
    N, Cin, Mp = x_flat.shape
    M = H * W
    assert Mp == M + 2 * (W + 1), (Mp, M, W)
    Cout = w.shape[0]
    Mo = M + 2 * out_pad

    # (Cout, Cin, 3, 3) OIHW -> (Cout, 9*Cin) with K index = (ky*3+kx)*Cin + c.
    w_stack = jnp.transpose(w, (0, 2, 3, 1)).reshape(Cout, 9 * Cin)
    w_stack = w_stack.astype(jnp.float32)

    # {0,1} masks killing column-wrap reads at the left/right image edges.
    col = jnp.arange(M, dtype=jnp.int32) % W
    edge_mask = jnp.stack([col >= 1, col <= W - 2], axis=0).astype(jnp.float32)
    gamma2 = gamma.reshape(Cout, 1).astype(jnp.float32)
    beta2 = beta.reshape(Cout, 1).astype(jnp.float32)

    vmem_limit = 32 * 1024 * 1024     # conservative scoped budget (fits v7x too)
    resident_bytes = 4 * (N * Cout * Mo          # revisited output block
                          + 9 * Cin * M          # stacked-tap scratch
                          + 2 * Cin * Mp         # double-buffered input blocks
                          + Cout * 9 * Cin + 2 * M + 2 * Cout)
    if resident_bytes > vmem_limit // 2:
        # TODO(synk): halo-tiled / two-pass fallback for large activations.
        raise NotImplementedError(
            "activation too large for the fused VMEM-resident path")

    conv_flops = 2 * N * M * 9 * Cin * Cout
    kernel = functools.partial(_fused_conv_bn_lrelu_kernel, H=H, W=W, Cin=Cin,
                               N_imgs=N, out_pad=out_pad, eps=eps)
    return pl.pallas_call(
        kernel,
        out_shape=jax.ShapeDtypeStruct((N, Cout, Mo), jnp.float32),
        grid=(N,),
        in_specs=[
            pl.BlockSpec((1, Cin, Mp), lambda n: (n, 0, 0)),
            pl.BlockSpec((Cout, 9 * Cin), lambda n: (0, 0)),
            pl.BlockSpec((2, M), lambda n: (0, 0)),
            pl.BlockSpec((Cout, 1), lambda n: (0, 0)),
            pl.BlockSpec((Cout, 1), lambda n: (0, 0)),
        ],
        # Revisited output block: stays resident in VMEM across the whole grid,
        # written back to HBM once after the final (BN + LeakyReLU) step.
        out_specs=pl.BlockSpec((N, Cout, Mo), lambda n: (0, 0, 0)),
        scratch_shapes=[pltpu.VMEM((9 * Cin, M), jnp.float32)],
        compiler_params=pltpu.CompilerParams(
            dimension_semantics=("arbitrary",),   # sequential: revisited output
            vmem_limit_bytes=vmem_limit),
        cost_estimate=pl.CostEstimate(
            flops=conv_flops, transcendentals=0,
            bytes_accessed=4 * (N * Cin * Mp + Cout * 9 * Cin + 2 * M
                                + 2 * Cout + N * Cout * Mo)),
    )(x_flat, w_stack, edge_mask, gamma2, beta2)


def double_conv(x_nchw, params, *, eps=1e-5):
    """Forward pass of DoubleConv.  Input/output are NCHW like PyTorch.

    The conv biases (b1, b2) are mathematically absorbed by the training-mode
    BatchNorm mean subtraction, so they are intentionally never loaded.
    """
    N, Cin, H, W = x_nchw.shape
    M = H * W
    pad = W + 1
    x_flat = jnp.pad(x_nchw.astype(jnp.float32).reshape(N, Cin, M),
                     ((0, 0), (0, 0), (pad, pad)))
    # Conv1 emits a pre-padded activation with zeroed halos so conv2 consumes
    # it directly — no HBM pad round trip between the two layers.
    h = conv_bn_lrelu(x_flat, params["w1"], params["g1"], params["be1"],
                      H=H, W=W, out_pad=pad, eps=eps)
    y = conv_bn_lrelu(h, params["w2"], params["g2"], params["be2"],
                      H=H, W=W, out_pad=0, eps=eps)
    Cout = params["w2"].shape[0]
    return y.reshape(N, Cout, H, W)        # free reshape -> NCHW


# ---------------- pure-JAX reference (correctness sanity check) --------------
def _ref_block(x_nchw, w, b, g, be):
    y = jax.lax.conv_general_dilated(
        x_nchw, w, window_strides=(1, 1), padding=((1, 1), (1, 1)),
        dimension_numbers=("NCHW", "OIHW", "NCHW"))
    y = y + b[None, :, None, None]
    mean = y.mean(axis=(0, 2, 3), keepdims=True)
    var = ((y - mean) ** 2).mean(axis=(0, 2, 3), keepdims=True)
    y = (y - mean) / jnp.sqrt(var + 1e-5)
    y = y * g[None, :, None, None] + be[None, :, None, None]
    return jnp.where(y > 0, y, 0.01 * y)


def double_conv_ref(x_nchw, p):
    y = _ref_block(x_nchw, p["w1"], p["b1"], p["g1"], p["be1"])
    return _ref_block(y, p["w2"], p["b2"], p["g2"], p["be2"])


if __name__ == "__main__":
    # DoubleConv(in_channels=4, out_channels=8) -> mid_channels = 8
    Cin, Cmid, Cout = 4, 8, 8
    N, H, W = 2, 16, 16

    key = jax.random.PRNGKey(0)
    ks = jax.random.split(key, 9)
    fan1, fan2 = Cin * 9, Cmid * 9
    params = {
        "w1": jax.random.normal(ks[0], (Cmid, Cin, 3, 3), jnp.float32) / jnp.sqrt(fan1),
        "b1": 0.1 * jax.random.normal(ks[1], (Cmid,), jnp.float32),
        "g1": 1.0 + 0.1 * jax.random.normal(ks[2], (Cmid,), jnp.float32),
        "be1": 0.1 * jax.random.normal(ks[3], (Cmid,), jnp.float32),
        "w2": jax.random.normal(ks[4], (Cout, Cmid, 3, 3), jnp.float32) / jnp.sqrt(fan2),
        "b2": 0.1 * jax.random.normal(ks[5], (Cout,), jnp.float32),
        "g2": 1.0 + 0.1 * jax.random.normal(ks[6], (Cout,), jnp.float32),
        "be2": 0.1 * jax.random.normal(ks[7], (Cout,), jnp.float32),
    }
    x = jax.random.normal(ks[8], (N, Cin, H, W), jnp.float32)

    out = jax.jit(double_conv)(x, params)
    out = jax.block_until_ready(out)

    ref = jax.block_until_ready(double_conv_ref(x, params))
    assert out.shape == (N, Cout, H, W), out.shape
    assert jnp.allclose(out, ref, atol=1e-3, rtol=1e-3), float(
        jnp.max(jnp.abs(out - ref)))

    print("KERNEL_OK")
</pallas_src>

<mosaic_0001>
module attributes {stable_mosaic.version = 11 : i64} {
  func.func @_fused_conv_bn_lrelu_kernel(%arg0: i32, %arg1: memref<1x4x290xf32, #tpu.memory_space<vmem>>, %arg2: memref<8x36xf32, #tpu.memory_space<vmem>>, %arg3: memref<2x256xf32, #tpu.memory_space<vmem>>, %arg4: memref<8x1xf32, #tpu.memory_space<vmem>>, %arg5: memref<8x1xf32, #tpu.memory_space<vmem>>, %arg6: memref<2x8x290xf32, #tpu.memory_space<vmem>>, %arg7: memref<36x256xf32, #tpu.memory_space<vmem>>) attributes {dimension_semantics = [#tpu.dimension_semantics<arbitrary>], iteration_bounds = array<i64: 2>, scalar_prefetch = 0 : i64, scratch_operands = 1 : i64, tpu.core_type = #tpu.core_type<tc>, window_params = [{transform_indices = @transform_0, window_bounds = array<i64: 1, 4, 290>}, {pipeline_mode = #tpu.pipeline_mode<synchronous>, transform_indices = @transform_1, window_bounds = array<i64: 8, 36>}, {pipeline_mode = #tpu.pipeline_mode<synchronous>, transform_indices = @transform_2, window_bounds = array<i64: 2, 256>}, {pipeline_mode = #tpu.pipeline_mode<synchronous>, transform_indices = @transform_3, window_bounds = array<i64: 8, 1>}, {pipeline_mode = #tpu.pipeline_mode<synchronous>, transform_indices = @transform_4, window_bounds = array<i64: 8, 1>}, {pipeline_mode = #tpu.pipeline_mode<synchronous>, transform_indices = @transform_5, window_bounds = array<i64: 2, 8, 290>}]} {
    %c0_i32 = arith.constant 0 : i32
    %0 = arith.cmpi eq, %arg0, %c0_i32 : i32
    %1 = arith.extui %0 : i1 to i32
    %c0_i32_0 = arith.constant 0 : i32
    %2 = arith.cmpi ne, %1, %c0_i32_0 : i32
    scf.if %2 {
      %cst_42 = arith.constant 0.000000e+00 : f32
      %54 = vector.broadcast %cst_42 : f32 to vector<2x8x290xf32>
      %c0_43 = arith.constant 0 : index
      %c0_44 = arith.constant 0 : index
      %c0_45 = arith.constant 0 : index
      %55 = vector.load %arg6[%c0_43, %c0_44, %c0_45] : memref<2x8x290xf32, #tpu.memory_space<vmem>>, vector<2x8x290xf32>
      tpu.vector_store %arg6[%c0_43, %c0_44, %c0_45], %54 {strides = array<i32>} : memref<2x8x290xf32, #tpu.memory_space<vmem>>, vector<2x8x290xf32>,
    } else {
    }
    %c0 = arith.constant 0 : index
    %c0_1 = arith.constant 0 : index
    %3 = vector.load %arg3[%c0, %c0_1] : memref<2x256xf32, #tpu.memory_space<vmem>>, vector<1x256xf32>
    %c1 = arith.constant 1 : index
    %c0_2 = arith.constant 0 : index
    %4 = vector.load %arg3[%c1, %c0_2] : memref<2x256xf32, #tpu.memory_space<vmem>>, vector<1x256xf32>
    %c0_3 = arith.constant 0 : index
    %c0_4 = arith.constant 0 : index
    %c0_5 = arith.constant 0 : index
    %5 = vector.load %arg1[%c0_3, %c0_4, %c0_5] : memref<1x4x290xf32, #tpu.memory_space<vmem>>, vector<1x4x256xf32>
    %6 = vector.shape_cast %5 : vector<1x4x256xf32> to vector<4x256xf32>
    %7 = vector.broadcast %3 : vector<1x256xf32> to vector<4x256xf32>
    %8 = arith.mulf %6, %7 : vector<4x256xf32>
    %c0_6 = arith.constant 0 : index
    %c0_7 = arith.constant 0 : index
    %9 = vector.load %arg7[%c0_6, %c0_7] : memref<36x256xf32, #tpu.memory_space<vmem>>, vector<4x256xf32>
    tpu.vector_store %arg7[%c0_6, %c0_7], %8 {strides = array<i32>} : memref<36x256xf32, #tpu.memory_space<vmem>>, vector<4x256xf32>,
    %c0_8 = arith.constant 0 : index
    %c0_9 = arith.constant 0 : index
    %c1_10 = arith.constant 1 : index
    %10 = vector.load %arg1[%c0_8, %c0_9, %c1_10] : memref<1x4x290xf32, #tpu.memory_space<vmem>>, vector<1x4x256xf32>
    %11 = vector.shape_cast %10 : vector<1x4x256xf32> to vector<4x256xf32>
    %c4 = arith.constant 4 : index
    %c0_11 = arith.constant 0 : index
    %12 = vector.load %arg7[%c4, %c0_11] : memref<36x256xf32, #tpu.memory_space<vmem>>, vector<4x256xf32>
    tpu.vector_store %arg7[%c4, %c0_11], %11 {strides = array<i32>} : memref<36x256xf32, #tpu.memory_space<vmem>>, vector<4x256xf32>,
    %c0_12 = arith.constant 0 : index
    %c0_13 = arith.constant 0 : index
    %c2 = arith.constant 2 : index
    %13 = vector.load %arg1[%c0_12, %c0_13, %c2] : memref<1x4x290xf32, #tpu.memory_space<vmem>>, vector<1x4x256xf32>
    %14 = vector.shape_cast %13 : vector<1x4x256xf32> to vector<4x256xf32>
    %15 = vector.broadcast %4 : vector<1x256xf32> to vector<4x256xf32>
    %16 = arith.mulf %14, %15 : vector<4x256xf32>
    %c8 = arith.constant 8 : index
    %c0_14 = arith.constant 0 : index
    %17 = vector.load %arg7[%c8, %c0_14] : memref<36x256xf32, #tpu.memory_space<vmem>>, vector<4x256xf32>
    tpu.vector_store %arg7[%c8, %c0_14], %16 {strides = array<i32>} : memref<36x256xf32, #tpu.memory_space<vmem>>, vector<4x256xf32>,
    %c0_15 = arith.constant 0 : index
    %c0_16 = arith.constant 0 : index
    %c16 = arith.constant 16 : index
    %18 = vector.load %arg1[%c0_15, %c0_16, %c16] : memref<1x4x290xf32, #tpu.memory_space<vmem>>, vector<1x4x256xf32>
    %19 = vector.shape_cast %18 : vector<1x4x256xf32> to vector<4x256xf32>
    %20 = vector.broadcast %3 : vector<1x256xf32> to vector<4x256xf32>
    %21 = arith.mulf %19, %20 : vector<4x256xf32>
    %c12 = arith.constant 12 : index
    %c0_17 = arith.constant 0 : index
    %22 = vector.load %arg7[%c12, %c0_17] : memref<36x256xf32, #tpu.memory_space<vmem>>, vector<4x256xf32>
    tpu.vector_store %arg7[%c12, %c0_17], %21 {strides = array<i32>} : memref<36x256xf32, #tpu.memory_space<vmem>>, vector<4x256xf32>,
    %c0_18 = arith.constant 0 : index
    %c0_19 = arith.constant 0 : index
    %c17 = arith.constant 17 : index
    %23 = vector.load %arg1[%c0_18, %c0_19, %c17] : memref<1x4x290xf32, #tpu.memory_space<vmem>>, vector<1x4x256xf32>
    %24 = vector.shape_cast %23 : vector<1x4x256xf32> to vector<4x256xf32>
    %c16_20 = arith.constant 16 : index
    %c0_21 = arith.constant 0 : index
    %25 = vector.load %arg7[%c16_20, %c0_21] : memref<36x256xf32, #tpu.memory_space<vmem>>, vector<4x256xf32>
    tpu.vector_store %arg7[%c16_20, %c0_21], %24 {strides = array<i32>} : memref<36x256xf32, #tpu.memory_space<vmem>>, vector<4x256xf32>,
    %c0_22 = arith.constant 0 : index
    %c0_23 = arith.constant 0 : index
    %c18 = arith.constant 18 : index
    %26 = vector.load %arg1[%c0_22, %c0_23, %c18] : memref<1x4x290xf32, #tpu.memory_space<vmem>>, vector<1x4x256xf32>
    %27 = vector.shape_cast %26 : vector<1x4x256xf32> to vector<4x256xf32>
    %28 = vector.broadcast %4 : vector<1x256xf32> to vector<4x256xf32>
    %29 = arith.mulf %27, %28 : vector<4x256xf32>
    %c20 = arith.constant 20 : index
    %c0_24 = arith.constant 0 : index
    %30 = vector.load %arg7[%c20, %c0_24] : memref<36x256xf32, #tpu.memory_space<vmem>>, vector<4x256xf32>
    tpu.vector_store %arg7[%c20, %c0_24], %29 {strides = array<i32>} : memref<36x256xf32, #tpu.memory_space<vmem>>, vector<4x256xf32>,
    %c0_25 = arith.constant 0 : index
    %c0_26 = arith.constant 0 : index
    %c32 = arith.constant 32 : index
    %31 = vector.load %arg1[%c0_25, %c0_26, %c32] : memref<1x4x290xf32, #tpu.memory_space<vmem>>, vector<1x4x256xf32>
    %32 = vector.shape_cast %31 : vector<1x4x256xf32> to vector<4x256xf32>
    %33 = vector.broadcast %3 : vector<1x256xf32> to vector<4x256xf32>
    %34 = arith.mulf %32, %33 : vector<4x256xf32>
    %c24 = arith.constant 24 : index
    %c0_27 = arith.constant 0 : index
    %35 = vector.load %arg7[%c24, %c0_27] : memref<36x256xf32, #tpu.memory_space<vmem>>, vector<4x256xf32>
    tpu.vector_store %arg7[%c24, %c0_27], %34 {strides = array<i32>} : memref<36x256xf32, #tpu.memory_space<vmem>>, vector<4x256xf32>,
    %c0_28 = arith.constant 0 : index
    %c0_29 = arith.constant 0 : index
    %c33 = arith.constant 33 : index
    %36 = vector.load %arg1[%c0_28, %c0_29, %c33] : memref<1x4x290xf32, #tpu.memory_space<vmem>>, vector<1x4x256xf32>
    %37 = vector.shape_cast %36 : vector<1x4x256xf32> to vector<4x256xf32>
    %c28 = arith.constant 28 : index
    %c0_30 = arith.constant 0 : index
    %38 = vector.load %arg7[%c28, %c0_30] : memref<36x256xf32, #tpu.memory_space<vmem>>, vector<4x256xf32>
    tpu.vector_store %arg7[%c28, %c0_30], %37 {strides = array<i32>} : memref<36x256xf32, #tpu.memory_space<vmem>>, vector<4x256xf32>,
    %c0_31 = arith.constant 0 : index
    %c0_32 = arith.constant 0 : index
    %c34 = arith.constant 34 : index
    %39 = vector.load %arg1[%c0_31, %c0_32, %c34] : memref<1x4x290xf32, #tpu.memory_space<vmem>>, vector<1x4x256xf32>
    %40 = vector.shape_cast %39 : vector<1x4x256xf32> to vector<4x256xf32>
    %41 = vector.broadcast %4 : vector<1x256xf32> to vector<4x256xf32>
    %42 = arith.mulf %40, %41 : vector<4x256xf32>
    %c32_33 = arith.constant 32 : index
    %c0_34 = arith.constant 0 : index
    %43 = vector.load %arg7[%c32_33, %c0_34] : memref<36x256xf32, #tpu.memory_space<vmem>>, vector<4x256xf32>
    tpu.vector_store %arg7[%c32_33, %c0_34], %42 {strides = array<i32>} : memref<36x256xf32, #tpu.memory_space<vmem>>, vector<4x256xf32>,
    %c0_35 = arith.constant 0 : index
    %c0_36 = arith.constant 0 : index
    %44 = vector.load %arg2[%c0_35, %c0_36] : memref<8x36xf32, #tpu.memory_space<vmem>>, vector<8x36xf32>
    %c0_37 = arith.constant 0 : index
    %c0_38 = arith.constant 0 : index
    %45 = vector.load %arg7[%c0_37, %c0_38] : memref<36x256xf32, #tpu.memory_space<vmem>>, vector<36x256xf32>
    %cst = arith.constant dense<0.000000e+00> : vector<8x256xf32>
    %46 = tpu.matmul %44, %45, %cst {dimension_numbers = #tpu.dot_dimension_numbers<[1], [0], [0], [1], [0, 0, 1, 1], [], []>} : vector<8x36xf32>, vector<36x256xf32>, vector<8x256xf32> -> vector<8x256xf32>
    %47 = arith.index_cast %arg0 : i32 to index
    %c0_39 = arith.constant 0 : index
    %c17_40 = arith.constant 17 : index
    %48 = vector.load %arg6[%47, %c0_39, %c17_40] : memref<2x8x290xf32, #tpu.memory_space<vmem>>, vector<1x8x256xf32>
    %49 = vector.shape_cast %48 : vector<1x8x256xf32> to vector<8x256xf32>
    %50 = vector.shape_cast %46 : vector<8x256xf32> to vector<1x8x256xf32>
    tpu.vector_store %arg6[%47, %c0_39, %c17_40], %50 {strides = array<i32>} : memref<2x8x290xf32, #tpu.memory_space<vmem>>, vector<1x8x256xf32>,
    %c1_i32 = arith.constant 1 : i32
    %51 = arith.cmpi eq, %arg0, %c1_i32 : i32
    %52 = arith.extui %51 : i1 to i32
    %c0_i32_41 = arith.constant 0 : i32
    %53 = arith.cmpi ne, %52, %c0_i32_41 : i32
    scf.if %53 {
      %c0_42 = arith.constant 0 : index
      %c0_43 = arith.constant 0 : index
      %c17_44 = arith.constant 17 : index
      %54 = vector.load %arg6[%c0_42, %c0_43, %c17_44] : memref<2x8x290xf32, #tpu.memory_space<vmem>>, vector<2x8x256xf32>
      %cst_45 = arith.constant dense<0.000000e+00> : vector<8x256xf32>
      %55 = vector.multi_reduction <add>, %54, %cst_45 [0] : vector<2x8x256xf32> to vector<8x256xf32>
      %cst_46 = arith.constant dense<0.000000e+00> : vector<8xf32>
      %56 = vector.multi_reduction <add>, %55, %cst_46 [1] : vector<8x256xf32> to vector<8xf32>
      %57 = vector.shape_cast %56 : vector<8xf32> to vector<8x1xf32>
      %cst_47 = arith.constant 5.120000e+02 : f32
      %58 = vector.broadcast %cst_47 : f32 to vector<8x1xf32>
      %59 = arith.divf %57, %58 : vector<8x1xf32>
      %60 = vector.shape_cast %59 : vector<8x1xf32> to vector<1x8x1xf32>
      %61 = vector.broadcast %60 : vector<1x8x1xf32> to vector<2x8x256xf32>
      %62 = arith.subf %54, %61 : vector<2x8x256xf32>
      %63 = arith.mulf %62, %62 : vector<2x8x256xf32>
      %cst_48 = arith.constant dense<0.000000e+00> : vector<8x256xf32>
      %64 = vector.multi_reduction <add>, %63, %cst_48 [0] : vector<2x8x256xf32> to vector<8x256xf32>
      %cst_49 = arith.constant dense<0.000000e+00> : vector<8xf32>
      %65 = vector.multi_reduction <add>, %64, %cst_49 [1] : vector<8x256xf32> to vector<8xf32>
      %66 = vector.shape_cast %65 : vector<8xf32> to vector<8x1xf32>
      %cst_50 = arith.constant 5.120000e+02 : f32
      %67 = vector.broadcast %cst_50 : f32 to vector<8x1xf32>
      %68 = arith.divf %66, %67 : vector<8x1xf32>
      %69 = vector.shape_cast %68 : vector<8x1xf32> to vector<1x8x1xf32>
      %c0_51 = arith.constant 0 : index
      %c0_52 = arith.constant 0 : index
      %70 = vector.load %arg4[%c0_51, %c0_52] : memref<8x1xf32, #tpu.memory_space<vmem>>, vector<8x1xf32>
      %71 = vector.shape_cast %70 : vector<8x1xf32> to vector<1x8x1xf32>
      %cst_53 = arith.constant 9.99999974E-6 : f32
      %72 = vector.broadcast %cst_53 : f32 to vector<1x8x1xf32>
      %73 = arith.addf %69, %72 : vector<1x8x1xf32>
      %74 = math.rsqrt %73 : vector<1x8x1xf32>
      %75 = arith.mulf %71, %74 : vector<1x8x1xf32>
      %76 = vector.broadcast %75 : vector<1x8x1xf32> to vector<2x8x256xf32>
      %77 = arith.mulf %62, %76 : vector<2x8x256xf32>
      %c0_54 = arith.constant 0 : index
      %c0_55 = arith.constant 0 : index
      %78 = vector.load %arg5[%c0_54, %c0_55] : memref<8x1xf32, #tpu.memory_space<vmem>>, vector<8x1xf32>
      %79 = vector.shape_cast %78 : vector<8x1xf32> to vector<1x8x1xf32>
      %80 = vector.broadcast %79 : vector<1x8x1xf32> to vector<2x8x256xf32>
      %81 = arith.addf %77, %80 : vector<2x8x256xf32>
      %cst_56 = arith.constant 0.000000e+00 : f32
      %82 = vector.broadcast %cst_56 : f32 to vector<2x8x256xf32>
      %83 = arith.cmpf ogt, %81, %82 : vector<2x8x256xf32>
      %cst_57 = arith.constant 0.00999999977 : f32
      %84 = vector.broadcast %cst_57 : f32 to vector<2x8x256xf32>
      %85 = arith.mulf %84, %81 : vector<2x8x256xf32>
      %86 = arith.select %83, %81, %85 : vector<2x8x256xi1>, vector<2x8x256xf32>
      %c0_58 = arith.constant 0 : index
      %c0_59 = arith.constant 0 : index
      %c17_60 = arith.constant 17 : index
      %87 = vector.load %arg6[%c0_58, %c0_59, %c17_60] : memref<2x8x290xf32, #tpu.memory_space<vmem>>, vector<2x8x256xf32>
      tpu.vector_store %arg6[%c0_58, %c0_59, %c17_60], %86 {strides = array<i32>} : memref<2x8x290xf32, #tpu.memory_space<vmem>>, vector<2x8x256xf32>,
    } else {
    }
    return
  }
  func.func @transform_0(%arg0: i32) -> (i32, i32, i32) {
    %c0_i32 = arith.constant 0 : i32
    %c0_i32_0 = arith.constant 0 : i32
    %c0_i32_1 = arith.constant 0 : i32
    return %arg0, %c0_i32, %c0_i32_0 : i32, i32, i32
  }
  func.func @transform_1(%arg0: i32) -> (i32, i32) {
    %c0_i32 = arith.constant 0 : i32
    %c0_i32_0 = arith.constant 0 : i32
    %c0_i32_1 = arith.constant 0 : i32
    return %c0_i32, %c0_i32_0 : i32, i32
  }
  func.func @transform_2(%arg0: i32) -> (i32, i32) {
    %c0_i32 = arith.constant 0 : i32
    %c0_i32_0 = arith.constant 0 : i32
    %c0_i32_1 = arith.constant 0 : i32
    return %c0_i32, %c0_i32_0 : i32, i32
  }
  func.func @transform_3(%arg0: i32) -> (i32, i32) {
    %c0_i32 = arith.constant 0 : i32
    %c0_i32_0 = arith.constant 0 : i32
    %c0_i32_1 = arith.constant 0 : i32
    return %c0_i32, %c0_i32_0 : i32, i32
  }
  func.func @transform_4(%arg0: i32) -> (i32, i32) {
    %c0_i32 = arith.constant 0 : i32
    %c0_i32_0 = arith.constant 0 : i32
    %c0_i32_1 = arith.constant 0 : i32
    return %c0_i32, %c0_i32_0 : i32, i32
  }
  func.func @transform_5(%arg0: i32) -> (i32, i32, i32) {
    %c0_i32 = arith.constant 0 : i32
    %c0_i32_0 = arith.constant 0 : i32
    %c0_i32_1 = arith.constant 0 : i32
    %c0_i32_2 = arith.constant 0 : i32
    return %c0_i32, %c0_i32_0, %c0_i32_1 : i32, i32, i32
  }
}

module attributes {stable_mosaic.version = 11 : i64} {
  func.func @_fused_conv_bn_lrelu_kernel(%arg0: i32, %arg1: memref<1x8x290xf32, #tpu.memory_space<vmem>>, %arg2: memref<8x72xf32, #tpu.memory_space<vmem>>, %arg3: memref<2x256xf32, #tpu.memory_space<vmem>>, %arg4: memref<8x1xf32, #tpu.memory_space<vmem>>, %arg5: memref<8x1xf32, #tpu.memory_space<vmem>>, %arg6: memref<2x8x256xf32, #tpu.memory_space<vmem>>, %arg7: memref<72x256xf32, #tpu.memory_space<vmem>>) attributes {dimension_semantics = [#tpu.dimension_semantics<arbitrary>], iteration_bounds = array<i64: 2>, scalar_prefetch = 0 : i64, scratch_operands = 1 : i64, tpu.core_type = #tpu.core_type<tc>, window_params = [{transform_indices = @transform_0, window_bounds = array<i64: 1, 8, 290>}, {pipeline_mode = #tpu.pipeline_mode<synchronous>, transform_indices = @transform_1, window_bounds = array<i64: 8, 72>}, {pipeline_mode = #tpu.pipeline_mode<synchronous>, transform_indices = @transform_2, window_bounds = array<i64: 2, 256>}, {pipeline_mode = #tpu.pipeline_mode<synchronous>, transform_indices = @transform_3, window_bounds = array<i64: 8, 1>}, {pipeline_mode = #tpu.pipeline_mode<synchronous>, transform_indices = @transform_4, window_bounds = array<i64: 8, 1>}, {pipeline_mode = #tpu.pipeline_mode<synchronous>, transform_indices = @transform_5, window_bounds = array<i64: 2, 8, 256>}]} {
    %c0 = arith.constant 0 : index
    %c0_0 = arith.constant 0 : index
    %0 = vector.load %arg3[%c0, %c0_0] : memref<2x256xf32, #tpu.memory_space<vmem>>, vector<1x256xf32>
    %c1 = arith.constant 1 : index
    %c0_1 = arith.constant 0 : index
    %1 = vector.load %arg3[%c1, %c0_1] : memref<2x256xf32, #tpu.memory_space<vmem>>, vector<1x256xf32>
    %c0_2 = arith.constant 0 : index
    %c0_3 = arith.constant 0 : index
    %c0_4 = arith.constant 0 : index
    %2 = vector.load %arg1[%c0_2, %c0_3, %c0_4] : memref<1x8x290xf32, #tpu.memory_space<vmem>>, vector<1x8x256xf32>
    %3 = vector.shape_cast %2 : vector<1x8x256xf32> to vector<8x256xf32>
    %4 = vector.broadcast %0 : vector<1x256xf32> to vector<8x256xf32>
    %5 = arith.mulf %3, %4 : vector<8x256xf32>
    %c0_5 = arith.constant 0 : index
    %c0_6 = arith.constant 0 : index
    %6 = vector.load %arg7[%c0_5, %c0_6] : memref<72x256xf32, #tpu.memory_space<vmem>>, vector<8x256xf32>
    tpu.vector_store %arg7[%c0_5, %c0_6], %5 {strides = array<i32>} : memref<72x256xf32, #tpu.memory_space<vmem>>, vector<8x256xf32>,
    %c0_7 = arith.constant 0 : index
    %c0_8 = arith.constant 0 : index
    %c1_9 = arith.constant 1 : index
    %7 = vector.load %arg1[%c0_7, %c0_8, %c1_9] : memref<1x8x290xf32, #tpu.memory_space<vmem>>, vector<1x8x256xf32>
    %8 = vector.shape_cast %7 : vector<1x8x256xf32> to vector<8x256xf32>
    %c8 = arith.constant 8 : index
    %c0_10 = arith.constant 0 : index
    %9 = vector.load %arg7[%c8, %c0_10] : memref<72x256xf32, #tpu.memory_space<vmem>>, vector<8x256xf32>
    tpu.vector_store %arg7[%c8, %c0_10], %8 {strides = array<i32>} : memref<72x256xf32, #tpu.memory_space<vmem>>, vector<8x256xf32>,
    %c0_11 = arith.constant 0 : index
    %c0_12 = arith.constant 0 : index
    %c2 = arith.constant 2 : index
    %10 = vector.load %arg1[%c0_11, %c0_12, %c2] : memref<1x8x290xf32, #tpu.memory_space<vmem>>, vector<1x8x256xf32>
    %11 = vector.shape_cast %10 : vector<1x8x256xf32> to vector<8x256xf32>
    %12 = vector.broadcast %1 : vector<1x256xf32> to vector<8x256xf32>
    %13 = arith.mulf %11, %12 : vector<8x256xf32>
    %c16 = arith.constant 16 : index
    %c0_13 = arith.constant 0 : index
    %14 = vector.load %arg7[%c16, %c0_13] : memref<72x256xf32, #tpu.memory_space<vmem>>, vector<8x256xf32>
    tpu.vector_store %arg7[%c16, %c0_13], %13 {strides = array<i32>} : memref<72x256xf32, #tpu.memory_space<vmem>>, vector<8x256xf32>,
    %c0_14 = arith.constant 0 : index
    %c0_15 = arith.constant 0 : index
    %c16_16 = arith.constant 16 : index
    %15 = vector.load %arg1[%c0_14, %c0_15, %c16_16] : memref<1x8x290xf32, #tpu.memory_space<vmem>>, vector<1x8x256xf32>
    %16 = vector.shape_cast %15 : vector<1x8x256xf32> to vector<8x256xf32>
    %17 = vector.broadcast %0 : vector<1x256xf32> to vector<8x256xf32>
    %18 = arith.mulf %16, %17 : vector<8x256xf32>
    %c24 = arith.constant 24 : index
    %c0_17 = arith.constant 0 : index
    %19 = vector.load %arg7[%c24, %c0_17] : memref<72x256xf32, #tpu.memory_space<vmem>>, vector<8x256xf32>
    tpu.vector_store %arg7[%c24, %c0_17], %18 {strides = array<i32>} : memref<72x256xf32, #tpu.memory_space<vmem>>, vector<8x256xf32>,
    %c0_18 = arith.constant 0 : index
    %c0_19 = arith.constant 0 : index
    %c17 = arith.constant 17 : index
    %20 = vector.load %arg1[%c0_18, %c0_19, %c17] : memref<1x8x290xf32, #tpu.memory_space<vmem>>, vector<1x8x256xf32>
    %21 = vector.shape_cast %20 : vector<1x8x256xf32> to vector<8x256xf32>
    %c32 = arith.constant 32 : index
    %c0_20 = arith.constant 0 : index
    %22 = vector.load %arg7[%c32, %c0_20] : memref<72x256xf32, #tpu.memory_space<vmem>>, vector<8x256xf32>
    tpu.vector_store %arg7[%c32, %c0_20], %21 {strides = array<i32>} : memref<72x256xf32, #tpu.memory_space<vmem>>, vector<8x256xf32>,
    %c0_21 = arith.constant 0 : index
    %c0_22 = arith.constant 0 : index
    %c18 = arith.constant 18 : index
    %23 = vector.load %arg1[%c0_21, %c0_22, %c18] : memref<1x8x290xf32, #tpu.memory_space<vmem>>, vector<1x8x256xf32>
    %24 = vector.shape_cast %23 : vector<1x8x256xf32> to vector<8x256xf32>
    %25 = vector.broadcast %1 : vector<1x256xf32> to vector<8x256xf32>
    %26 = arith.mulf %24, %25 : vector<8x256xf32>
    %c40 = arith.constant 40 : index
    %c0_23 = arith.constant 0 : index
    %27 = vector.load %arg7[%c40, %c0_23] : memref<72x256xf32, #tpu.memory_space<vmem>>, vector<8x256xf32>
    tpu.vector_store %arg7[%c40, %c0_23], %26 {strides = array<i32>} : memref<72x256xf32, #tpu.memory_space<vmem>>, vector<8x256xf32>,
    %c0_24 = arith.constant 0 : index
    %c0_25 = arith.constant 0 : index
    %c32_26 = arith.constant 32 : index
    %28 = vector.load %arg1[%c0_24, %c0_25, %c32_26] : memref<1x8x290xf32, #tpu.memory_space<vmem>>, vector<1x8x256xf32>
    %29 = vector.shape_cast %28 : vector<1x8x256xf32> to vector<8x256xf32>
    %30 = vector.broadcast %0 : vector<1x256xf32> to vector<8x256xf32>
    %31 = arith.mulf %29, %30 : vector<8x256xf32>
    %c48 = arith.constant 48 : index
    %c0_27 = arith.constant 0 : index
    %32 = vector.load %arg7[%c48, %c0_27] : memref<72x256xf32, #tpu.memory_space<vmem>>, vector<8x256xf32>
    tpu.vector_store %arg7[%c48, %c0_27], %31 {strides = array<i32>} : memref<72x256xf32, #tpu.memory_space<vmem>>, vector<8x256xf32>,
    %c0_28 = arith.constant 0 : index
    %c0_29 = arith.constant 0 : index
    %c33 = arith.constant 33 : index
    %33 = vector.load %arg1[%c0_28, %c0_29, %c33] : memref<1x8x290xf32, #tpu.memory_space<vmem>>, vector<1x8x256xf32>
    %34 = vector.shape_cast %33 : vector<1x8x256xf32> to vector<8x256xf32>
    %c56 = arith.constant 56 : index
    %c0_30 = arith.constant 0 : index
    %35 = vector.load %arg7[%c56, %c0_30] : memref<72x256xf32, #tpu.memory_space<vmem>>, vector<8x256xf32>
    tpu.vector_store %arg7[%c56, %c0_30], %34 {strides = array<i32>} : memref<72x256xf32, #tpu.memory_space<vmem>>, vector<8x256xf32>,
    %c0_31 = arith.constant 0 : index
    %c0_32 = arith.constant 0 : index
    %c34 = arith.constant 34 : index
    %36 = vector.load %arg1[%c0_31, %c0_32, %c34] : memref<1x8x290xf32, #tpu.memory_space<vmem>>, vector<1x8x256xf32>
    %37 = vector.shape_cast %36 : vector<1x8x256xf32> to vector<8x256xf32>
    %38 = vector.broadcast %1 : vector<1x256xf32> to vector<8x256xf32>
    %39 = arith.mulf %37, %38 : vector<8x256xf32>
    %c64 = arith.constant 64 : index
    %c0_33 = arith.constant 0 : index
    %40 = vector.load %arg7[%c64, %c0_33] : memref<72x256xf32, #tpu.memory_space<vmem>>, vector<8x256xf32>
    tpu.vector_store %arg7[%c64, %c0_33], %39 {strides = array<i32>} : memref<72x256xf32, #tpu.memory_space<vmem>>, vector<8x256xf32>,
    %c0_34 = arith.constant 0 : index
    %c0_35 = arith.constant 0 : index
    %41 = vector.load %arg2[%c0_34, %c0_35] : memref<8x72xf32, #tpu.memory_space<vmem>>, vector<8x72xf32>
    %c0_36 = arith.constant 0 : index
    %c0_37 = arith.constant 0 : index
    %42 = vector.load %arg7[%c0_36, %c0_37] : memref<72x256xf32, #tpu.memory_space<vmem>>, vector<72x256xf32>
    %cst = arith.constant dense<0.000000e+00> : vector<8x256xf32>
    %43 = tpu.matmul %41, %42, %cst {dimension_numbers = #tpu.dot_dimension_numbers<[1], [0], [0], [1], [0, 0, 1, 1], [], []>} : vector<8x72xf32>, vector<72x256xf32>, vector<8x256xf32> -> vector<8x256xf32>
    %44 = arith.index_cast %arg0 : i32 to index
    %c0_38 = arith.constant 0 : index
    %c0_39 = arith.constant 0 : index
    %45 = vector.load %arg6[%44, %c0_38, %c0_39] : memref<2x8x256xf32, #tpu.memory_space<vmem>>, vector<1x8x256xf32>
    %46 = vector.shape_cast %45 : vector<1x8x256xf32> to vector<8x256xf32>
    %47 = vector.shape_cast %43 : vector<8x256xf32> to vector<1x8x256xf32>
    tpu.vector_store %arg6[%44, %c0_38, %c0_39], %47 {strides = array<i32>} : memref<2x8x256xf32, #tpu.memory_space<vmem>>, vector<1x8x256xf32>,
    %c1_i32 = arith.constant 1 : i32
    %48 = arith.cmpi eq, %arg0, %c1_i32 : i32
    %49 = arith.extui %48 : i1 to i32
    %c0_i32 = arith.constant 0 : i32
    %50 = arith.cmpi ne, %49, %c0_i32 : i32
    scf.if %50 {
      %c0_40 = arith.constant 0 : index
      %c0_41 = arith.constant 0 : index
      %c0_42 = arith.constant 0 : index
      %51 = vector.load %arg6[%c0_40, %c0_41, %c0_42] : memref<2x8x256xf32, #tpu.memory_space<vmem>>, vector<2x8x256xf32>
      %cst_43 = arith.constant dense<0.000000e+00> : vector<8x256xf32>
      %52 = vector.multi_reduction <add>, %51, %cst_43 [0] : vector<2x8x256xf32> to vector<8x256xf32>
      %cst_44 = arith.constant dense<0.000000e+00> : vector<8xf32>
      %53 = vector.multi_reduction <add>, %52, %cst_44 [1] : vector<8x256xf32> to vector<8xf32>
      %54 = vector.shape_cast %53 : vector<8xf32> to vector<8x1xf32>
      %cst_45 = arith.constant 5.120000e+02 : f32
      %55 = vector.broadcast %cst_45 : f32 to vector<8x1xf32>
      %56 = arith.divf %54, %55 : vector<8x1xf32>
      %57 = vector.shape_cast %56 : vector<8x1xf32> to vector<1x8x1xf32>
      %58 = vector.broadcast %57 : vector<1x8x1xf32> to vector<2x8x256xf32>
      %59 = arith.subf %51, %58 : vector<2x8x256xf32>
      %60 = arith.mulf %59, %59 : vector<2x8x256xf32>
      %cst_46 = arith.constant dense<0.000000e+00> : vector<8x256xf32>
      %61 = vector.multi_reduction <add>, %60, %cst_46 [0] : vector<2x8x256xf32> to vector<8x256xf32>
      %cst_47 = arith.constant dense<0.000000e+00> : vector<8xf32>
      %62 = vector.multi_reduction <add>, %61, %cst_47 [1] : vector<8x256xf32> to vector<8xf32>
      %63 = vector.shape_cast %62 : vector<8xf32> to vector<8x1xf32>
      %cst_48 = arith.constant 5.120000e+02 : f32
      %64 = vector.broadcast %cst_48 : f32 to vector<8x1xf32>
      %65 = arith.divf %63, %64 : vector<8x1xf32>
      %66 = vector.shape_cast %65 : vector<8x1xf32> to vector<1x8x1xf32>
      %c0_49 = arith.constant 0 : index
      %c0_50 = arith.constant 0 : index
      %67 = vector.load %arg4[%c0_49, %c0_50] : memref<8x1xf32, #tpu.memory_space<vmem>>, vector<8x1xf32>
      %68 = vector.shape_cast %67 : vector<8x1xf32> to vector<1x8x1xf32>
      %cst_51 = arith.constant 9.99999974E-6 : f32
      %69 = vector.broadcast %cst_51 : f32 to vector<1x8x1xf32>
      %70 = arith.addf %66, %69 : vector<1x8x1xf32>
      %71 = math.rsqrt %70 : vector<1x8x1xf32>
      %72 = arith.mulf %68, %71 : vector<1x8x1xf32>
      %73 = vector.broadcast %72 : vector<1x8x1xf32> to vector<2x8x256xf32>
      %74 = arith.mulf %59, %73 : vector<2x8x256xf32>
      %c0_52 = arith.constant 0 : index
      %c0_53 = arith.constant 0 : index
      %75 = vector.load %arg5[%c0_52, %c0_53] : memref<8x1xf32, #tpu.memory_space<vmem>>, vector<8x1xf32>
      %76 = vector.shape_cast %75 : vector<8x1xf32> to vector<1x8x1xf32>
      %77 = vector.broadcast %76 : vector<1x8x1xf32> to vector<2x8x256xf32>
      %78 = arith.addf %74, %77 : vector<2x8x256xf32>
      %cst_54 = arith.constant 0.000000e+00 : f32
      %79 = vector.broadcast %cst_54 : f32 to vector<2x8x256xf32>
      %80 = arith.cmpf ogt, %78, %79 : vector<2x8x256xf32>
      %cst_55 = arith.constant 0.00999999977 : f32
      %81 = vector.broadcast %cst_55 : f32 to vector<2x8x256xf32>
      %82 = arith.mulf %81, %78 : vector<2x8x256xf32>
      %83 = arith.select %80, %78, %82 : vector<2x8x256xi1>, vector<2x8x256xf32>
      %c0_56 = arith.constant 0 : index
      %c0_57 = arith.constant 0 : index
      %c0_58 = arith.constant 0 : index
      %84 = vector.load %arg6[%c0_56, %c0_57, %c0_58] : memref<2x8x256xf32, #tpu.memory_space<vmem>>, vector<2x8x256xf32>
      tpu.vector_store %arg6[%c0_56, %c0_57, %c0_58], %83 {strides = array<i32>} : memref<2x8x256xf32, #tpu.memory_space<vmem>>, vector<2x8x256xf32>,
    } else {
    }
    return
  }
  func.func @transform_0(%arg0: i32) -> (i32, i32, i32) {
    %c0_i32 = arith.constant 0 : i32
    %c0_i32_0 = arith.constant 0 : i32
    %c0_i32_1 = arith.constant 0 : i32
    return %arg0, %c0_i32, %c0_i32_0 : i32, i32, i32
  }
  func.func @transform_1(%arg0: i32) -> (i32, i32) {
    %c0_i32 = arith.constant 0 : i32
    %c0_i32_0 = arith.constant 0 : i32
    %c0_i32_1 = arith.constant 0 : i32
    return %c0_i32, %c0_i32_0 : i32, i32
  }
  func.func @transform_2(%arg0: i32) -> (i32, i32) {
    %c0_i32 = arith.constant 0 : i32
    %c0_i32_0 = arith.constant 0 : i32
    %c0_i32_1 = arith.constant 0 : i32
    return %c0_i32, %c0_i32_0 : i32, i32
  }
  func.func @transform_3(%arg0: i32) -> (i32, i32) {
    %c0_i32 = arith.constant 0 : i32
    %c0_i32_0 = arith.constant 0 : i32
    %c0_i32_1 = arith.constant 0 : i32
    return %c0_i32, %c0_i32_0 : i32, i32
  }
  func.func @transform_4(%arg0: i32) -> (i32, i32) {
    %c0_i32 = arith.constant 0 : i32
    %c0_i32_0 = arith.constant 0 : i32
    %c0_i32_1 = arith.constant 0 : i32
    return %c0_i32, %c0_i32_0 : i32, i32
  }
  func.func @transform_5(%arg0: i32) -> (i32, i32, i32) {
    %c0_i32 = arith.constant 0 : i32
    %c0_i32_0 = arith.constant 0 : i32
    %c0_i32_1 = arith.constant 0 : i32
    %c0_i32_2 = arith.constant 0 : i32
    return %c0_i32, %c0_i32_0, %c0_i32_1 : i32, i32, i32
  }
}

</mosaic_0001>

<bundles_post_ra>
// kernel: double_conv.2
= control target key start
LH: loop header
LB: loop body
LE: loop exit
PB: predicated region body
PF: predicated region fallthrough
CT: control target
= control target key end

     0   :  { %s829_s18 = smov 0   ;;  %s984_s0 = inlined_call_operand.vmem [shape: f32[2,4,290], index: 0, kind: input, shape index: {}]   ;;  %s985_s1 = inlined_call_operand.vmem [shape: f32[8,36], index: 1, kind: input, shape index: {}]   ;;  %s986_s2 = inlined_call_operand.vmem [shape: f32[2,256], index: 2, kind: input, shape index: {}]   ;;  %s987_s3 = inlined_call_operand.vmem [shape: f32[8,1], index: 3, kind: input, shape index: {}]   ;;  %s988_s4 = inlined_call_operand.vmem [shape: f32[8,1], index: 4, kind: input, shape index: {}]   ;;  %s989_s5 = inlined_call_operand.vmem [shape: f32[2,8,290], index: 5, kind: output, shape index: {}]  }
   0x1 LB: > { %s835_s19 = sadd.s32 4294967295, %s779_s18   ;;  %p728_p0 = scmp.ge.s32.totalorder %s779_s18, 1  ;;  %s779_s18 = sphi %s829_s18, %s15_s18  }
   0x2   : > { %p182_p1 = scmp.lt.s32.totalorder %s779_s18, 3 }
   0x4   : > { %p183_p2 = pnand %p728_p0, %p182_p1 }
   0x5   : > { %p205_p3 = scmp.lt.s32.totalorder (!%p183_p2), %s835_s19, 1  ;;  %p730_p4 = scmp.ne.s32.totalorder (!%p183_p2), %s835_s19, 0 }
   0x6   : > { %186 = sbr.rel (%p183_p2) target bundleno = 1238 (0x4d6), region = 40 }
   0xb   : > { %s206_s20 = scalar_select %p205_p3, %s835_s19, 1 }
   0xc   : > { %213 = sbr.rel (%p730_p4) target bundleno = 24 (0x18), region = 44 }
   0xd   : > { %s741_s21 = smul.u32 12, %s206_s20 }
   0xf   : > { %s844_s24 = scalar_lea.vmem %s984_s0, %s741_s21 }
  0x11   : > { %v781_v0 = vmov 0.0   ;;  %vm216_vm0 = vcmask 277504  }
  0x12   : > { %214 = vst [vmem:[%s989_s5] sm:$0xff] %v781_v0 }
  0x13   : > { %215 = vst [vmem:[%s989_s5 + $0x8] sm:$0xff] %v781_v0 }
  0x14   : > { %218 = vst [vmem:[%s989_s5 + $0x18] sm:$0xff] %v781_v0 }
  0x15   : > { %219 = vst [vmem:[%s989_s5 + $0x20] sm:$0xff] %v781_v0 }
  0x16   : > { %217 = vst.msk [vmem:[%s989_s5 + $0x10] sm:$0xff] %vm216_vm0, %v781_v0 }
  0x17   : > { %220 = vst.msk [vmem:[%s989_s5 + $0x28] sm:$0xff] %vm216_vm0, %v781_v0 }
  0x18 PF: > { %v731_v1 = vld [vmem:[%s986_s2 + $0x1] ss:$2 sm:$0x3]  ;;  %v221_v4 = vld [vmem:[%s986_s2] ss:$2 sm:$0x3] }
  0x19   : > { %v268_v2 = vperm.slane %v731_v1, 0  ;;  %v269_v3 = vperm.slane %v731_v1, 1  ;;  %vm229_vm1 = vcmask 1043456   ;;  %v226_v5 = vperm.slane %v221_v4, 0  ;;  %v242_v7 = vld [vmem:[%s844_s24 + $0x8] sm:$0xf] }
  0x1a   : > { %v227_v6 = vperm.slane %v221_v4, 1  ;;  %248 = vst [vmem:[#allocation1 + $0x11] ss:$2 sm:$0xff] %v242_v7  ;;  %v873_v9 = vld [vmem:[%s844_s24] sm:$0xff]  ;;  %s782_s16 = smov 2   ;;  %s783_s17 = smov 18  }
  0x1b   : > { %v270_v8 = vrot.slane %v269_v3, 4  ;;  %s784_s20 = smov 34   ;;  %s785_s21 = smov 16   ;;  %v266_v16 = vld [vmem:[%s844_s24 + $0x8] sm:$0xf]  ;;  %vm275_vm2 = vcmask 15360  }
  0x1c   : > { %v228_v10 = vrot.slane %v227_v6, 4  ;;  %s786_s22 = smov 32   ;;  %v303_v25 = vld [vmem:[%s844_s24 + $0x8] sm:$0xf]  ;;  %vm307_vm3 = vcmask 130048   ;;  %s787_s23 = smov 126  }
  0x1d   : > { %v271_v11 = vsel %vm229_vm1, %v268_v2, %v270_v8  ;;  %v336_v35 = vld [vmem:[%s844_s24 + $0x8] sm:$0xf]  ;;  %s788_s25 = smov 112   ;;  %vm363_vm4 = vcmask 146432   ;;  %s789_s26 = smov 111   ;;  %vm396_vm5 = vcmask 261120  }
  0x1e   : > { %272 = vrot.lane.b32.xlu0 %v271_v11, %s782_s16  ;;  %v230_v12 = vsel %vm229_vm1, %v226_v5, %v228_v10  ;;  %360 = vrot.lane.b32.xlu1 %v271_v11, %s783_s17  ;;  %v359_v37 = vld [vmem:[%s844_s24 + $0x8] sm:$0xf]  ;;  %s790_s27 = smov 110   ;;  %s791_s28 = smov 96   ;;  %vm452_vm6 = vcmask 277504   ;;  %vm295_vm7 = vcmask 1031168  }
  0x1f   : > { %v232_v13 = vmul.f32 %v230_v12, %v873_v9  ;;  %449 = vrot.lane.b32.xlu2 %v271_v11, %s784_s20  ;;  %v392_v46 = vld [vmem:[%s844_s24 + $0x8] sm:$0xf]  ;;  %s792_s29 = smov 95   ;;  %s794_s30 = smov 127   ;;  %vm328_vm8 = vcmask 916480   ;;  %vm351_vm9 = vcmask 908288  }
  0x20   : > { %v424_v56 = vld [vmem:[%s844_s24 + $0x8] sm:$0xf]  ;;  %vm384_vm10 = vcmask 900096   ;;  %vm416_vm11 = vcmask 785408   ;;  %vm440_vm12 = vcmask 777216   ;;  %vm472_vm13 = vcmask 769024  }
  0x21   : > { %234 = vst [vmem:[#allocation1] ss:$2 sm:$0xff] %v232_v13  ;;  %v880_v19 = vld.sshfl [vmem:[#allocation1 + $0x10] sm:$0xff pattern:$0x75316420]  ;;  %vm258_vm14 = vcmask 1039360  }
  0x22   : > { %v448_v59 = vld [vmem:[%s844_s24 + $0x8] sm:$0xf]  ;;  %s793_s24 = smov 94   ;;  %vm490_vm15 = vcmask 293888   ;;  %s795_s8 = smov 17   ;;  %vm554_vm0 = vcmask 1047688  }
  0x23   : > { %s740_s9 = smul.u32 24, %s835_s19  ;;  %p737_p5 = scmp.ne.s32.totalorder %s835_s19, 1 }
  0x24   : > { %s796_s19 = smov (!%p737_p5), 111  }
  0x25   : > { %s553_s12 = scalar_lea.vmem %s989_s5, %s740_s9 }
  0x26   : > { %304 = vrot.lane.b32.xlu0 %v230_v12, %s785_s21  ;;  %393 = vrot.lane.b32.xlu1 %v230_v12, %s786_s22 }
  0x28   : > { %v235_v14 = vld.sshfl [vmem:[#allocation1] sm:$0xff pattern:$0x75316420]  ;;  %v236_v15 = vld.sshfl [vmem:[#allocation1 + $0x8] sm:$0xff pattern:$0x75316420] }
  0x29   : > { %246 = vst [vmem:[#allocation1 + $0x1] ss:$2 sm:$0xff] %v873_v9 }
  0x2a   : > { %239 = vst [vmem:[#allocation2 + $0x30] sm:$0xf] %v235_v14 }
  0x2b   : > { %240 = vst [vmem:[#allocation2] sm:$0xf] %v236_v15 }
  0x30   : > { %v882_v20 = vld.sshfl [vmem:[#allocation1] sm:$0xff pattern:$0x75316420]  ;;  %v884_v21 = vld.sshfl [vmem:[#allocation1 + $0x8] sm:$0xff pattern:$0x75316420] }
  0x79   : > { %v450_v57 = vpop.permute.xlu2 %449 }
  0x7a   : > { %v451_v60 = vrot.slane %v450_v57, 4 }
  0x7c   : > { %v457_v63 = vmul.f32 %v451_v60, %v448_v59  ;;  %v453_v0 = vsel %vm452_vm6, %v451_v60, %v450_v57  ;;  %v479_v57 = vld [vmem:[%s985_s1] sm:$0xff] }
  0x7d   : > { %v456_v2 = vmul.f32 %v453_v0, %v873_v9 }
  0x90   : > { %v273_v17 = vpop.permute.xlu0 %272  ;;  %v361_v34 = vpop.permute.xlu1 %360 }
  0x91   : > { %v274_v18 = vrot.slane %v273_v17, 4  ;;  %v362_v38 = vrot.slane %v361_v34, 4 }
  0x93   : > { %v276_v22 = vsel %vm275_vm2, %v274_v18, %v273_v17  ;;  %v280_v23 = vmul.f32 %v274_v18, %v266_v16  ;;  %v368_v41 = vmul.f32 %v362_v38, %v359_v37  ;;  %v364_v42 = vsel %vm363_vm4, %v362_v38, %v361_v34 }
  0x94   : > { %v279_v24 = vmul.f32 %v276_v22, %v873_v9  ;;  %v367_v45 = vmul.f32 %v364_v42, %v873_v9 }
  0x95   : > { %285 = vst [vmem:[#allocation1 + $0x10] ss:$2 sm:$0xff] %v280_v23 }
  0x96   : > { %283 = vst [vmem:[#allocation1] ss:$2 sm:$0xff] %v279_v24 }
  0x98   : > { %v305_v26 = vpop.permute.xlu0 %304  ;;  %v394_v43 = vpop.permute.xlu1 %393 }
  0x99   : > { %v306_v27 = vrot.slane %v305_v26, 4  ;;  %v395_v47 = vrot.slane %v394_v43, 4 }
  0x9b   : > { %v308_v28 = vsel %vm307_vm3, %v306_v27, %v305_v26  ;;  %v312_v29 = vmul.f32 %v306_v27, %v303_v25  ;;  %v401_v50 = vmul.f32 %v395_v47, %v392_v46  ;;  %v397_v51 = vsel %vm396_vm5, %v395_v47, %v394_v43 }
  0x9c   : > { %v288_v30 = vld.sshfl [vmem:[#allocation1 + $0x10] sm:$0xff pattern:$0x75316420]  ;;  %v311_v31 = vmul.f32 %v308_v28, %v873_v9  ;;  %v400_v53 = vmul.f32 %v397_v51, %v873_v9 }
  0x9d   : > { %318 = vst [vmem:[#allocation1 + $0x11] ss:$2 sm:$0xff] %v312_v29  ;;  %293 = vrot.lane.b32.xlu1 %v288_v30, %s787_s23  ;;  %v287_v32 = vld.sshfl [vmem:[#allocation1 + $0x8] sm:$0xff pattern:$0x75316420] }
  0x9e   : > { %291 = vrot.lane.b32.xlu0 %v287_v32, %s787_s23  ;;  %v286_v33 = vld.sshfl [vmem:[#allocation1] sm:$0xff pattern:$0x75316420] }
  0x9f   : > { %289 = vrot.lane.b32.xlu2 %v286_v33, %s787_s23  ;;  %316 = vst [vmem:[#allocation1 + $0x1] ss:$2 sm:$0xff] %v311_v31 }
  0xa4   : > { %v321_v36 = vld.sshfl [vmem:[#allocation1 + $0x10] sm:$0xff pattern:$0x75316420] }
  0xa5   : > { %326 = vrot.lane.b32.xlu1 %v321_v36, %s788_s25  ;;  %341 = vst [vmem:[#allocation1 + $0x10] ss:$2 sm:$0xff] %v336_v35 }
  0xa6   : > { %v320_v39 = vld.sshfl [vmem:[#allocation1 + $0x8] sm:$0xff pattern:$0x75316420]  ;;  %v319_v40 = vld.sshfl [vmem:[#allocation1] sm:$0xff pattern:$0x75316420] }
  0xa7   : > { %324 = vrot.lane.b32.xlu0 %v320_v39, %s788_s25  ;;  %322 = vrot.lane.b32.xlu2 %v319_v40, %s788_s25  ;;  %339 = vst [vmem:[#allocation1] ss:$2 sm:$0xff] %v873_v9 }
  0xac   : > { %v344_v44 = vld.sshfl [vmem:[#allocation1 + $0x10] sm:$0xff pattern:$0x75316420] }
  0xad   : > { %349 = vrot.lane.b32.xlu1 %v344_v44, %s789_s26  ;;  %374 = vst [vmem:[#allocation1 + $0x11] ss:$2 sm:$0xff] %v368_v41 }
  0xae   : > { %v343_v48 = vld.sshfl [vmem:[#allocation1 + $0x8] sm:$0xff pattern:$0x75316420]  ;;  %v342_v49 = vld.sshfl [vmem:[#allocation1] sm:$0xff pattern:$0x75316420] }
  0xaf   : > { %347 = vrot.lane.b32.xlu0 %v343_v48, %s789_s26  ;;  %345 = vrot.lane.b32.xlu2 %v342_v49, %s789_s26  ;;  %372 = vst [vmem:[#allocation1 + $0x1] ss:$2 sm:$0xff] %v367_v45 }
  0xb4   : > { %v377_v52 = vld.sshfl [vmem:[#allocation1 + $0x10] sm:$0xff pattern:$0x75316420] }
  0xb5   : > { %382 = vrot.lane.b32.xlu1 %v377_v52, %s790_s27  ;;  %406 = vst [vmem:[#allocation1 + $0x10] ss:$2 sm:$0xff] %v401_v50 }
  0xb6   : > { %v376_v54 = vld.sshfl [vmem:[#allocation1 + $0x8] sm:$0xff pattern:$0x75316420]  ;;  %v375_v55 = vld.sshfl [vmem:[#allocation1] sm:$0xff pattern:$0x75316420] }
  0xb7   : > { %380 = vrot.lane.b32.xlu0 %v376_v54, %s790_s27  ;;  %378 = vrot.lane.b32.xlu2 %v375_v55, %s790_s27  ;;  %404 = vst [vmem:[#allocation1] ss:$2 sm:$0xff] %v400_v53 }
  0xbc   : > { %v409_v58 = vld.sshfl [vmem:[#allocation1 + $0x10] sm:$0xff pattern:$0x75316420] }
  0xbd   : > { %414 = vrot.lane.b32.xlu1 %v409_v58, %s791_s28  ;;  %430 = vst [vmem:[#allocation1 + $0x11] ss:$2 sm:$0xff] %v424_v56 }
  0xbe   : > { %v408_v61 = vld.sshfl [vmem:[#allocation1 + $0x8] sm:$0xff pattern:$0x75316420]  ;;  %v407_v62 = vld.sshfl [vmem:[#allocation1] sm:$0xff pattern:$0x75316420] }
  0xbf   : > { %412 = vrot.lane.b32.xlu0 %v408_v61, %s791_s28  ;;  %410 = vrot.lane.b32.xlu2 %v407_v62, %s791_s28  ;;  %428 = vst [vmem:[#allocation1 + $0x1] ss:$2 sm:$0xff] %v873_v9 }
  0xc4   : > { %v433_v1 = vld.sshfl [vmem:[#allocation1 + $0x10] sm:$0xff pattern:$0x75316420] }
  0xc5   : > { %438 = vrot.lane.b32.xlu1 %v433_v1, %s792_s29  ;;  %462 = vst [vmem:[#allocation1 + $0x10] ss:$2 sm:$0xff] %v457_v63 }
  0xc6   : > { %v432_v3 = vld.sshfl [vmem:[#allocation1 + $0x8] sm:$0xff pattern:$0x75316420]  ;;  %v431_v4 = vld.sshfl [vmem:[#allocation1] sm:$0xff pattern:$0x75316420] }
  0xc7   : > { %436 = vrot.lane.b32.xlu0 %v432_v3, %s792_s29  ;;  %434 = vrot.lane.b32.xlu2 %v431_v4, %s792_s29  ;;  %460 = vst [vmem:[#allocation1] ss:$2 sm:$0xff] %v456_v2 }
  0xcc   : > { %v465_v5 = vld.sshfl [vmem:[#allocation1 + $0x10] sm:$0xff pattern:$0x75316420] }
  0xcd   : > { %470 = vrot.lane.b32.xlu1 %v465_v5, %s793_s24 }
  0xce   : > { %v464_v6 = vld.sshfl [vmem:[#allocation1 + $0x8] sm:$0xff pattern:$0x75316420]  ;;  %v463_v7 = vld.sshfl [vmem:[#allocation1] sm:$0xff pattern:$0x75316420] }
  0xcf   : > { %468 = vrot.lane.b32.xlu0 %v464_v6, %s793_s24  ;;  %466 = vrot.lane.b32.xlu2 %v463_v7, %s793_s24 }
  0xd5   : > { %256 = vrot.lane.b32.xlu1 %v880_v19, %s794_s30 }
  0xd7   : > { %254 = vrot.lane.b32.xlu0 %v884_v21, %s794_s30  ;;  %252 = vrot.lane.b32.xlu2 %v882_v20, %s794_s30 }
  0xf9   : > { %v290_v8 = vpop.permute.xlu2 %289 }
 0x101   : > { %v323_v9 = vpop.permute.xlu2 %322 }
 0x109   : > { %v346_v14 = vpop.permute.xlu2 %345 }
 0x10f   : > { %v294_v10 = vpop.permute.xlu1 %293 }
 0x110   : > { %v292_v11 = vpop.permute.xlu0 %291 }
 0x111   : > { %v296_v12 = vsel %vm295_vm7, %v290_v8, %v292_v11  ;;  %v297_v13 = vsel %vm295_vm7, %v292_v11, %v294_v10  ;;  %v379_v20 = vpop.permute.xlu2 %378 }
 0x112   : > { %300 = vst [vmem:[#allocation2 + $0x18] sm:$0xf] %v296_v12 }
 0x113   : > { %301 = vst [vmem:[#allocation2 + $0x10] sm:$0xf] %v297_v13 }
 0x117   : > { %v327_v15 = vpop.permute.xlu1 %326 }
 0x119   : > { %v325_v16 = vpop.permute.xlu0 %324  ;;  %v411_v28 = vpop.permute.xlu2 %410 }
 0x11a   : > { %v329_v17 = vsel %vm328_vm8, %v323_v9, %v325_v16  ;;  %v330_v18 = vsel %vm328_vm8, %v325_v16, %v327_v15 }
 0x11b   : > { %333 = vst [vmem:[#allocation2 + $0x18] sm:$0xf0] %v329_v17 }
 0x11c   : > { %334 = vst [vmem:[#allocation2 + $0x10] sm:$0xf0] %v330_v18 }
 0x11f   : > { %v350_v19 = vpop.permute.xlu1 %349 }
 0x121   : > { %v348_v21 = vpop.permute.xlu0 %347  ;;  %v435_v33 = vpop.permute.xlu2 %434 }
 0x122   : > { %v352_v22 = vsel %vm351_vm9, %v346_v14, %v348_v21  ;;  %v353_v23 = vsel %vm351_vm9, %v348_v21, %v350_v19  ;;  %v482_v54 = vld [vmem:[#allocation2 + $0x18] sm:$0xff] }
 0x123   : > { %356 = vst [vmem:[#allocation2 + $0x48] sm:$0xf] %v352_v22  ;;  %v483_v55 = vld [vmem:[#allocation2 + $0x10] sm:$0xff] }
 0x124   : > { %357 = vst [vmem:[#allocation2 + $0x28] sm:$0xf] %v353_v23 }
 0x127   : > { %v383_v24 = vpop.permute.xlu1 %382 }
 0x129   : > { %v381_v25 = vpop.permute.xlu0 %380  ;;  %v467_v38 = vpop.permute.xlu2 %466 }
 0x12a   : > { %v385_v26 = vsel %vm384_vm10, %v379_v20, %v381_v25  ;;  %v386_v27 = vsel %vm384_vm10, %v381_v25, %v383_v24 }
 0x12b   : > { %389 = vst [vmem:[#allocation2 + $0x48] sm:$0xf0] %v385_v26 }
 0x12c   : > { %390 = vst [vmem:[#allocation2 + $0x28] sm:$0xf0] %v386_v27 }
 0x12f   : > { %v415_v29 = vpop.permute.xlu1 %414 }
 0x131   : > { %v413_v30 = vpop.permute.xlu0 %412  ;;  %v253_v44 = vpop.permute.xlu2 %252 }
 0x132   : > { %v417_v31 = vsel %vm416_vm11, %v411_v28, %v413_v30  ;;  %v418_v32 = vsel %vm416_vm11, %v413_v30, %v415_v29  ;;  %v484_v52 = vld [vmem:[#allocation2 + $0x48] sm:$0xff] }
 0x133   : > { %421 = vst [vmem:[#allocation2 + $0x8] sm:$0xf] %v417_v31  ;;  %v485_v53 = vld [vmem:[#allocation2 + $0x28] sm:$0xff] }
 0x134   : > { %422 = vst [vmem:[#allocation2 + $0x20] sm:$0xf] %v418_v32 }
 0x137   : > { %v439_v34 = vpop.permute.xlu1 %438 }
 0x139   : > { %v437_v35 = vpop.permute.xlu0 %436 }
 0x13a   : > { %v441_v36 = vsel %vm440_vm12, %v435_v33, %v437_v35  ;;  %v442_v37 = vsel %vm440_vm12, %v437_v35, %v439_v34 }
 0x13b   : > { %445 = vst [vmem:[#allocation2 + $0x8] sm:$0xf0] %v441_v36 }
 0x13c   : > { %446 = vst [vmem:[#allocation2 + $0x20] sm:$0xf0] %v442_v37 }
 0x13f   : > { %v471_v39 = vpop.permute.xlu1 %470 }
 0x141   : > { %v469_v40 = vpop.permute.xlu0 %468 }
 0x142   : > { %v473_v41 = vsel %vm472_vm13, %v467_v38, %v469_v40  ;;  %v474_v42 = vsel %vm472_vm13, %v469_v40, %v471_v39  ;;  %v486_v50 = vld [vmem:[#allocation2 + $0x8] sm:$0xff] }
 0x143   : > { %477 = vst [vmem:[#allocation2 + $0x40] sm:$0xf] %v473_v41  ;;  %v487_v51 = vld [vmem:[#allocation2 + $0x20] sm:$0xff] }
 0x144   : > { %478 = vst [vmem:[#allocation2 + $0x38] sm:$0xf] %v474_v42 }
 0x147   : > { %v257_v43 = vpop.permute.xlu1 %256 }
 0x149   : > { %v255_v45 = vpop.permute.xlu0 %254 }
 0x14a   : > { %v260_v46 = vsel %vm258_vm14, %v255_v45, %v257_v43  ;;  %v259_v47 = vsel %vm258_vm14, %v253_v44, %v255_v45  ;;  %v488_v48 = vld [vmem:[#allocation2 + $0x40] sm:$0xf] }
 0x14b   : > { %264 = vst [vmem:[#allocation2] sm:$0xf0] %v260_v46  ;;  %732 = vmatpush.msk.msra.mxu0 %vm229_vm1, %v488_v48  ;;  %v489_v49 = vld [vmem:[#allocation2 + $0x38] sm:$0xf] }
 0x14c   : > { %263 = vst [vmem:[#allocation2 + $0x30] sm:$0xf0] %v259_v47  ;;  %734 = vmatpush.msk.msra.mxu1 %vm229_vm1, %v489_v49  ;;  %vm546_vm1 = vcmask 138240  }
 0x14d   : > { %512 = vmatpush.msra.mxu0 %v486_v50 }
 0x14e   : > { %532 = vmatpush.msra.mxu1 %v487_v51 }
 0x14f   : > { %513 = vmatpush.msra.mxu0 %v484_v52 }
 0x150   : > { %533 = vmatpush.msra.mxu1 %v485_v53 }
 0x151   : > { %514 = vmatpush.msra.mxu0 %v482_v54 }
 0x152   : > { %534 = vmatpush.msra.mxu1 %v483_v55  ;;  %v481_v56 = vld [vmem:[#allocation2] sm:$0xff] }
 0x153   : > { %v480_v58 = vld [vmem:[#allocation2 + $0x30] sm:$0xff] }
 0x154   : > { %515 = vmatpush.msra.mxu0 %v480_v58  ;;  %535 = vmatpush.msra.mxu1 %v481_v56 }
 0x155   : > { %735 = vmatmul.msk.f32.vlgmr.msra.gmra.mxu1 %vm490_vm15, %v479_v57  ;;  %733 = vmatmul.msk.f32.vlgmr.msra.gmra.mxu0 %vm490_vm15, %v479_v57 }
 0x1d2   : > { %v537_v59 = vpop.f32.mrf.mxu1  ;;  %v517_v60 = vpop.f32.mrf.mxu0 }
 0x1d3   : > { %544 = vrot.lane.b32.xlu0 %v537_v59, %s795_s8  ;;  %542 = vrot.lane.b32.xlu2 %v517_v60, %s795_s8 }
 0x22d   : > { %v543_v61 = vpop.permute.xlu2 %542 }
 0x22e   : > { %555 = vst.msk [vmem:[%s553_s12] sm:$0xff] %vm554_vm0, %v543_v61 }
 0x243   : > { %561 = sbr.rel (%p737_p5) target bundleno = 1238 (0x4d6), region = 48 }
 0x245   : > { %v545_v62 = vpop.permute.xlu0 %544 }
 0x246   : > { %557 = vst.msk [vmem:[%s553_s12 + $0x10] sm:$0xff] %vm546_vm1, %v545_v62  ;;  %v547_v63 = vsel %vm546_vm1, %v543_v61, %v545_v62 }
 0x247   : > { %556 = vst [vmem:[%s553_s12 + $0x8] sm:$0xff] %v547_v63 }
 0x248   : > { %v797_v19 = vmov 512.0   ;;  %v798_v53 = vmov 0   ;;  %v635_v62 = vld [vmem:[%s987_s3] sm:$0xff] }
 0x249   : > { %769 = vrcp.f32 %v797_v19  ;;  %768 = vset.pattern.permute.xlu0 %v798_v53 }
 0x24e   : > { %v562_v0 = vld [vmem:[%s989_s5] sm:$0xff]  ;;  %v565_v1 = vld [vmem:[%s989_s5 + $0x18] sm:$0xff]  ;;  %v564_v2 = vld [vmem:[%s989_s5 + $0x10] sm:$0xff] }
 0x24f   : > { %v568_v3 = vsel %vm554_vm0, %v562_v0, 0.0  ;;  %v569_v4 = vsel %vm554_vm0, %v565_v1, 0.0  ;;  %v567_v5 = vld [vmem:[%s989_s5 + $0x28] sm:$0xff]  ;;  %v572_v6 = vsel %vm546_vm1, %v564_v2, 0.0  ;;  %v566_v11 = vld [vmem:[%s989_s5 + $0x20] sm:$0xff]  ;;  %v770_v20 = vpop.eup %769 }
 0x250   : > { %v570_v7 = vadd.f32 %v569_v4, %v568_v3  ;;  %v573_v8 = vsel %vm546_vm1, %v567_v5, 0.0  ;;  %v563_v10 = vld [vmem:[%s989_s5 + $0x8] sm:$0xff]  ;;  %v592_v21 = vmul.f32 512.0, %v770_v20  ;;  %vm596_vm2 = vweird.f32 %v770_v20 }
 0x251   : > { %v574_v9 = vadd.f32 %v573_v8, %v572_v6  ;;  %v571_v12 = vadd.f32 %v566_v11, %v563_v10 }
 0x252   : > { %578 = vrot.lane.b32.xlu0 %v570_v7, %s796_s19  ;;  %v593_v22 = vsub.f32 1.0, %v592_v21 }
 0x253   : > { %582 = vrot.lane.b32.xlu1 %v574_v9, %s796_s19 }
 0x254   : > { %v594_v23 = vmul.f32 %v770_v20, %v593_v22 }
 0x256   : > { %v595_v24 = vadd.f32 %v770_v20, %v594_v23 }
 0x258   : > { %v597_v25 = vsel %vm596_vm2, %v770_v20, %v595_v24 }
 0x25a   : > { %580 = vrot.lane.b32.xlu0 %v571_v12, %s796_s19 }
 0x2c4   : > { %v579_v13 = vpop.permute.xlu0 %578 }
 0x2c5   : > { %v583_v14 = vpop.permute.xlu1 %582 }
 0x2cc   : > { %v581_v15 = vpop.permute.xlu0 %580 }
 0x2cd   : > { %v584_v16 = vsel %vm351_vm9, %v579_v13, %v581_v15  ;;  %v585_v17 = vsel %vm351_vm9, %v581_v15, %v583_v14 }
 0x2ce   : > { %v588_v18 = vadd.f32 %v585_v17, %v584_v16 }
 0x2d0   : > { %589 = vadd.xlane.f32.xlu1 %v588_v18 }
 0x343   : > { %v590_v26 = vpop.xlane.xlu1 %589 }
 0x344   : > { %v598_v27 = vmul.f32 %v597_v25, %v590_v26 }
 0x346   : > { %v601_v28 = vsub.f32 %v564_v2, %v598_v27  ;;  %v604_v29 = vsub.f32 %v567_v5, %v598_v27  ;;  %v599_v30 = vsub.f32 %v562_v0, %v598_v27  ;;  %v602_v31 = vsub.f32 %v565_v1, %v598_v27  ;;  %v659_v2 = vld [vmem:[%s988_s4] sm:$0xff] }
 0x347   : > { %v600_v42 = vsub.f32 %v563_v10, %v598_v27  ;;  %v603_v43 = vsub.f32 %v566_v11, %v598_v27 }
 0x348   : > { %v607_v32 = vmul.f32 %v601_v28, %v601_v28  ;;  %v610_v33 = vmul.f32 %v604_v29, %v604_v29  ;;  %v605_v34 = vmul.f32 %v599_v30, %v599_v30  ;;  %v608_v35 = vmul.f32 %v602_v31, %v602_v31 }
 0x349   : > { %v606_v44 = vmul.f32 %v600_v42, %v600_v42  ;;  %v609_v45 = vmul.f32 %v603_v43, %v603_v43 }
 0x34a   : > { %v615_v36 = vsel %vm546_vm1, %v607_v32, 0.0  ;;  %v616_v37 = vsel %vm546_vm1, %v610_v33, 0.0  ;;  %v611_v38 = vsel %vm554_vm0, %v605_v34, 0.0  ;;  %v612_v39 = vsel %vm554_vm0, %v608_v35, 0.0 }
 0x34b   : > { %v617_v40 = vadd.f32 %v616_v37, %v615_v36  ;;  %v613_v41 = vadd.f32 %v612_v39, %v611_v38  ;;  %v614_v46 = vadd.f32 %v609_v45, %v606_v44 }
 0x34d   : > { %625 = vrot.lane.b32.xlu0 %v617_v40, %s796_s19  ;;  %621 = vrot.lane.b32.xlu2 %v613_v41, %s796_s19 }
 0x355   : > { %623 = vrot.lane.b32.xlu2 %v614_v46, %s796_s19 }
 0x3a7   : > { %v622_v47 = vpop.permute.xlu2 %621 }
 0x3af   : > { %v624_v48 = vpop.permute.xlu2 %623 }
 0x3b0   : > { %v627_v50 = vsel %vm351_vm9, %v622_v47, %v624_v48 }
 0x3bf   : > { %v626_v49 = vpop.permute.xlu0 %625 }
 0x3c0   : > { %v628_v51 = vsel %vm351_vm9, %v624_v48, %v626_v49 }
 0x3c1   : > { %v631_v52 = vadd.f32 %v628_v51, %v627_v50 }
 0x3c3   : > { %632 = vadd.xlane.f32.xlu2 %v631_v52 }
 0x436   : > { %v633_v54 = vpop.xlane.xlu2 %632 }
 0x437   : > { %v634_v55 = vmul.f32 %v633_v54, %v597_v25 }
 0x439   : > { %v636_v56 = vadd.f32 1e-05, %v634_v55 }
 0x43b   : > { %771 = vrsqrt.f32 %v636_v56  ;;  %vm643_vm4 = vweird.f32 %v636_v56 }
 0x441   : > { %v772_v57 = vpop.eup %771 }
 0x442   : > { %v638_v58 = vmul.f32 %v772_v57, %v636_v56  ;;  %vm644_vm3 = vweird.f32 %v772_v57 }
 0x443   : > { %vm645_vm5 = vmor %vm643_vm4, %vm644_vm3 }
 0x444   : > { %v639_v59 = vmul.f32 %v772_v57, %v638_v58 }
 0x446   : > { %v640_v60 = vmul.f32 0.5, %v639_v59 }
 0x448   : > { %v641_v61 = vsub.f32 1.5, %v640_v60 }
 0x44a   : > { %v642_v63 = vmul.f32 %v772_v57, %v641_v61 }
 0x44c   : > { %v646_v0 = vsel %vm645_vm5, %v772_v57, %v642_v63 }
 0x44d   : > { %v647_v1 = vmul.f32 %v646_v0, %v635_v62 }
 0x44f   : > { %650 = vperm.xlu0 %768, %v647_v1  }
 0x457   : > { %662 = vperm.xlu0 %768, %v659_v2  }
 0x4c1   : > { %v651_v3 = vpop.permute.xlu0 %650 }
 0x4c2   : > { %v653_v4 = vmul.f32 %v651_v3, %v599_v30  ;;  %v654_v5 = vmul.f32 %v651_v3, %v600_v42  ;;  %v655_v6 = vmul.f32 %v651_v3, %v601_v28  ;;  %v656_v7 = vmul.f32 %v651_v3, %v602_v31 }
 0x4c3   : > { %v657_v8 = vmul.f32 %v651_v3, %v603_v43  ;;  %v658_v9 = vmul.f32 %v651_v3, %v604_v29 }
 0x4c9   : > { %v663_v10 = vpop.permute.xlu0 %662 }
 0x4ca   : > { %v665_v11 = vadd.f32 %v663_v10, %v653_v4  ;;  %v666_v12 = vadd.f32 %v663_v10, %v654_v5  ;;  %v667_v13 = vadd.f32 %v663_v10, %v655_v6  ;;  %v668_v14 = vadd.f32 %v663_v10, %v656_v7 }
 0x4cb   : > { %v669_v15 = vadd.f32 %v663_v10, %v657_v8  ;;  %v670_v16 = vadd.f32 %v663_v10, %v658_v9 }
 0x4cc   : > { %vm671_vm6 = vcmp.gt.f32.partialorder %v665_v11, 0.0  ;;  %vm672_vm7 = vcmp.gt.f32.partialorder %v666_v12, 0.0  ;;  %vm673_vm8 = vcmp.gt.f32.partialorder %v667_v13, 0.0  ;;  %vm674_vm9 = vcmp.gt.f32.partialorder %v668_v14, 0.0 }
 0x4cd   : > { %vm675_vm10 = vcmp.gt.f32.partialorder %v669_v15, 0.0  ;;  %v677_v17 = vmul.f32 0.01, %v665_v11  ;;  %v678_v18 = vmul.f32 0.01, %v666_v12  ;;  %vm676_vm11 = vcmp.gt.f32.partialorder %v670_v16, 0.0 }
 0x4ce   : > { %v679_v19 = vmul.f32 0.01, %v667_v13  ;;  %v680_v20 = vmul.f32 0.01, %v668_v14  ;;  %v681_v21 = vmul.f32 0.01, %v669_v15 }
 0x4cf   : > { %v682_v22 = vmul.f32 0.01, %v670_v16  ;;  %v683_v23 = vsel %vm671_vm6, %v665_v11, %v677_v17  ;;  %v684_v24 = vsel %vm672_vm7, %v666_v12, %v678_v18 }
 0x4d0   : > { %v685_v25 = vsel %vm673_vm8, %v667_v13, %v679_v19  ;;  %v686_v26 = vsel %vm674_vm9, %v668_v14, %v680_v20  ;;  %689 = vst.msk [vmem:[%s989_s5] sm:$0xff] %vm554_vm0, %v683_v23  ;;  %v687_v27 = vsel %vm675_vm10, %v669_v15, %v681_v21 }
 0x4d1   : > { %690 = vst [vmem:[%s989_s5 + $0x8] sm:$0xff] %v684_v24  ;;  %v688_v28 = vsel %vm676_vm11, %v670_v16, %v682_v22 }
 0x4d2   : > { %691 = vst.msk [vmem:[%s989_s5 + $0x10] sm:$0xff] %vm546_vm1, %v685_v25 }
 0x4d3   : > { %692 = vst.msk [vmem:[%s989_s5 + $0x18] sm:$0xff] %vm554_vm0, %v686_v26 }
 0x4d4   : > { %693 = vst [vmem:[%s989_s5 + $0x20] sm:$0xff] %v687_v27 }
 0x4d5   : > { %694 = vst.msk [vmem:[%s989_s5 + $0x28] sm:$0xff] %vm546_vm1, %v688_v28 }
 0x4d6 PF: > { %s15_s18 = sadd.s32 1, %s779_s18  }
 0x4d7   : > { %p12_p6 = scmp.ge.s32.totalorder %s15_s18, 4  }
 0x4d9   :  { %14 = sbr.rel (!%p12_p6) target bundleno = 1 (0x1), region = 88 }

// kernel: double_conv.3
= control target key start
LH: loop header
LB: loop body
LE: loop exit
PB: predicated region body
PF: predicated region fallthrough
CT: control target
= control target key end

     0   :  { %s757_s18 = smov 0   ;;  %s859_s0 = inlined_call_operand.vmem [shape: f32[2,8,290], index: 0, kind: input, shape index: {}]   ;;  %s860_s1 = inlined_call_operand.vmem [shape: f32[8,72], index: 1, kind: input, shape index: {}]   ;;  %s861_s2 = inlined_call_operand.vmem [shape: f32[2,256], index: 2, kind: input, shape index: {}]   ;;  %s862_s3 = inlined_call_operand.vmem [shape: f32[8,1], index: 3, kind: input, shape index: {}]   ;;  %s863_s4 = inlined_call_operand.vmem [shape: f32[8,1], index: 4, kind: input, shape index: {}]   ;;  %s864_s5 = inlined_call_operand.vmem [shape: f32[2,8,256], index: 5, kind: output, shape index: {}]  }
   0x1 LB: > { %s763_s19 = sadd.s32 4294967295, %s710_s18   ;;  %p623_p0 = scmp.ge.s32.totalorder %s710_s18, 1  ;;  %s710_s18 = sphi %s757_s18, %s15_s18  }
   0x2   : > { %p182_p1 = scmp.lt.s32.totalorder %s710_s18, 3 }
   0x4   : > { %p183_p2 = pnand %p623_p0, %p182_p1 }
   0x5   : > { %s712_s24 = smov (!%p183_p2), 34   ;;  %s713_s25 = smov (!%p183_p2), 18  }
   0x6   : > { %186 = sbr.rel (%p183_p2) target bundleno = 823 (0x337), region = 40  ;;  %s714_s26 = smov (!%p183_p2), 32  }
   0x7   : > { %p205_p3 = scmp.lt.s32.totalorder (!%p183_p2), %s763_s19, 1  ;;  %s715_s28 = smov (!%p183_p2), 16  }
   0x8   : > { %s716_s29 = smov (!%p183_p2), 2   ;;  %s717_s9 = smov (!%p183_p2), 95  }
   0x9   : > { %s718_s10 = smov (!%p183_p2), 111   ;;  %s719_s11 = smov (!%p183_p2), 94  }
   0xa   : > { %s720_s12 = smov (!%p183_p2), 96   ;;  %s721_s13 = smov (!%p183_p2), 110  }
   0xb   : > { %v625_v0 = vld [vmem:[%s861_s2 + $0x1] ss:$2 sm:$0x3]  ;;  %v210_v2 = vld [vmem:[%s861_s2] ss:$2 sm:$0x3] }
   0xc   : > { %v247_v1 = vperm.slane %v625_v0, 0  ;;  %v773_v3 = vperm.slane %v210_v2, 0  ;;  %v248_v4 = vperm.slane %v625_v0, 1  ;;  %v776_v5 = vperm.slane %v210_v2, 1  ;;  %s206_s27 = scalar_select %p205_p3, %s763_s19, 1 }
   0xd   : > { %vm415_vm0 = vcmask 277504   ;;  %vm334_vm1 = vcmask 146432   ;;  %vm365_vm2 = vcmask 261120   ;;  %s722_s14 = smov 112   ;;  %vm253_vm3 = vcmask 15360   ;;  %s723_s15 = smov 127  }
   0xe   : > { %411 = vrot.lane.b32.xlu0 %v247_v1, %s712_s24  ;;  %330 = vrot.lane.b32.xlu2 %v247_v1, %s713_s25  ;;  %s634_s30 = smul.u32 24, %s206_s27  ;;  %vm284_vm4 = vcmask 130048   ;;  %s724_s16 = smov 126   ;;  %vm432_vm5 = vcmask 769024   ;;  %vm401_vm6 = vcmask 777216   ;;  %vm382_vm7 = vcmask 785408  }
   0xf   : > { %361 = vrot.lane.b32.xlu1 %v773_v3, %s714_s26  ;;  %vm351_vm8 = vcmask 900096   ;;  %vm320_vm9 = vcmask 908288   ;;  %vm301_vm10 = vcmask 916480   ;;  %vm270_vm11 = vcmask 1031168   ;;  %s633_s21 = sshll.u32 %s763_s19, 4  ;;  %p630_p4 = scmp.ne.s32.totalorder %s763_s19, 1 }
  0x10   : > { %s209_s8 = scalar_lea.vmem %s859_s0, %s634_s30  ;;  %vm236_vm12 = vcmask 1039360   ;;  %vm458_vm13 = vcmask 588800  }
  0x11   : > { %v786_v6 = vld [vmem:[%s209_s8 + $0x10] sm:$0xff]  ;;  %v788_v7 = vld [vmem:[%s209_s8] sm:$0xff]  ;;  %v790_v8 = vld [vmem:[%s209_s8 + $0x8] sm:$0xff] }
  0x12   : > { %v658_v9 = vpack.i.bf16 %v790_v8, %v788_v7 }
  0x16   : > { %413 = vrot.lane.b32.xlu0 %v248_v4, %s712_s24  ;;  %332 = vrot.lane.b32.xlu2 %v248_v4, %s713_s25  ;;  %s504_s24 = scalar_lea.vmem %s864_s5, %s633_s21 }
  0x17   : > { %363 = vrot.lane.b32.xlu1 %v776_v5, %s714_s26 }
  0x1e   : > { %280 = vrot.lane.b32.xlu0 %v773_v3, %s715_s28  ;;  %249 = vrot.lane.b32.xlu2 %v247_v1, %s716_s29 }
  0x1f   : > { %282 = vrot.lane.b32.xlu1 %v776_v5, %s715_s28 }
  0x26   : > { %251 = vrot.lane.b32.xlu0 %v248_v4, %s716_s29 }
  0x27   : > { %399 = vrot.lane.b32.xlu1 %v786_v6, %s717_s9 }
  0x2e   : > { %659 = vrot.lane.b32.xlu0 %v658_v9, %s717_s9 }
  0x2f   : > { %318 = vrot.lane.b32.xlu1 %v786_v6, %s718_s10 }
  0x36   : > { %664 = vrot.lane.b32.xlu0 %v658_v9, %s718_s10 }
  0x68   : > { %v331_v10 = vpop.permute.xlu2 %330 }
  0x69   : > { %v339_v24 = vmul.f32 %v788_v7, %v331_v10 }
  0x70   : > { %v333_v18 = vpop.permute.xlu2 %332 }
  0x71   : > { %v335_v22 = vsel %vm334_vm1, %v331_v10, %v333_v18  ;;  %v341_v23 = vmul.f32 %v786_v6, %v333_v18 }
  0x72   : > { %v340_v25 = vmul.f32 %v790_v8, %v335_v22 }
  0x74   : > { %v678_v30 = vpack.i.bf16 %v340_v25, %v339_v24 }
  0x78   : > { %v250_v33 = vpop.permute.xlu2 %249 }
  0x79   : > { %v258_v34 = vmul.f32 %v788_v7, %v250_v33 }
  0x80   : > { %v412_v11 = vpop.permute.xlu0 %411 }
  0x81   : > { %v362_v12 = vpop.permute.xlu1 %361  ;;  %v420_v17 = vmul.f32 %v412_v11, %v788_v7 }
  0x82   : > { %v370_v31 = vmul.f32 %v788_v7, %v362_v12 }
  0x88   : > { %v414_v13 = vpop.permute.xlu0 %413 }
  0x89   : > { %v416_v14 = vsel %vm415_vm0, %v412_v11, %v414_v13  ;;  %v422_v15 = vmul.f32 %v414_v13, %v786_v6  ;;  %v364_v16 = vpop.permute.xlu1 %363 }
  0x8a   : > { %v421_v19 = vmul.f32 %v416_v14, %v790_v8  ;;  %v372_v20 = vmul.f32 %v786_v6, %v364_v16  ;;  %v366_v28 = vsel %vm365_vm2, %v362_v12, %v364_v16 }
  0x8b   : > { %430 = vrot.lane.b32.xlu2 %v422_v15, %s719_s11  ;;  %v371_v32 = vmul.f32 %v790_v8, %v366_v28 }
  0x8c   : > { %380 = vrot.lane.b32.xlu0 %v372_v20, %s720_s12  ;;  %v668_v21 = vpack.i.bf16 %v421_v19, %v420_v17 }
  0x8d   : > { %v673_v37 = vpack.i.bf16 %v371_v32, %v370_v31  ;;  %v220_v31 = vmul.f32 %v788_v7, %v773_v3  ;;  %v439_v32 = vld [vmem:[%s860_s1] sm:$0xff] }
  0x8e   : > { %669 = vrot.lane.b32.xlu1 %v668_v21, %s719_s11 }
  0x90   : > { %v281_v26 = vpop.permute.xlu0 %280 }
  0x91   : > { %v283_v27 = vpop.permute.xlu1 %282  ;;  %v289_v41 = vmul.f32 %v788_v7, %v281_v26 }
  0x92   : > { %v291_v29 = vmul.f32 %v786_v6, %v283_v27  ;;  %v285_v38 = vsel %vm284_vm4, %v281_v26, %v283_v27 }
  0x93   : > { %349 = vrot.lane.b32.xlu2 %v341_v23, %s721_s13  ;;  %v290_v42 = vmul.f32 %v790_v8, %v285_v38 }
  0x94   : > { %299 = vrot.lane.b32.xlu0 %v291_v29, %s722_s14 }
  0x95   : > { %v683_v43 = vpack.i.bf16 %v290_v42, %v289_v41 }
  0x96   : > { %679 = vrot.lane.b32.xlu1 %v678_v30, %s721_s13 }
  0x98   : > { %v252_v35 = vpop.permute.xlu0 %251 }
  0x99   : > { %v254_v36 = vsel %vm253_vm3, %v250_v33, %v252_v35  ;;  %v260_v44 = vmul.f32 %v786_v6, %v252_v35  ;;  %v400_v47 = vpop.permute.xlu1 %399 }
  0x9a   : > { %v259_v39 = vmul.f32 %v790_v8, %v254_v36 }
  0x9b   : > { %674 = vrot.lane.b32.xlu2 %v673_v37, %s720_s12 }
  0x9c   : > { %v688_v40 = vpack.i.bf16 %v259_v39, %v258_v34  ;;  %694 = vrot.lane.b32.xlu0 %v658_v9, %s723_s15  ;;  %v221_v34 = vmul.f32 %v790_v8, %v776_v5 }
  0x9e   : > { %689 = vrot.lane.b32.xlu1 %v688_v40, %s724_s16 }
  0xa0   : > { %v660_v46 = vpop.permute.xlu0 %659 }
  0xa1   : > { %v319_v50 = vpop.permute.xlu1 %318  ;;  %v662_v54 = vunpack.i.h.bf16 %v660_v46  ;;  %v661_v55 = vunpack.i.l.bf16 %v660_v46 }
  0xa3   : > { %684 = vrot.lane.b32.xlu2 %v683_v43, %s722_s14  ;;  %v402_v62 = vsel %vm401_vm6, %v661_v55, %v662_v54  ;;  %v403_v63 = vsel %vm401_vm6, %v662_v54, %v400_v47 }
  0xa6   : > { %234 = vrot.lane.b32.xlu1 %v786_v6, %s723_s15 }
  0xa8   : > { %v665_v49 = vpop.permute.xlu0 %664 }
  0xa9   : > { %v667_v9 = vunpack.i.h.bf16 %v665_v49  ;;  %v666_v10 = vunpack.i.l.bf16 %v665_v49 }
  0xab   : > { %268 = vrot.lane.b32.xlu2 %v260_v44, %s724_s16  ;;  %v321_v17 = vsel %vm320_vm9, %v666_v10, %v667_v9  ;;  %v322_v18 = vsel %vm320_vm9, %v667_v9, %v319_v50 }
  0xe5   : > { %v431_v45 = vpop.permute.xlu2 %430 }
  0xed   : > { %v350_v48 = vpop.permute.xlu2 %349 }
  0xf5   : > { %v675_v51 = vpop.permute.xlu2 %674 }
  0xf6   : > { %v677_v58 = vunpack.i.h.bf16 %v675_v51  ;;  %v676_v59 = vunpack.i.l.bf16 %v675_v51 }
  0xf8   : > { %v383_v1 = vsel %vm382_vm7, %v676_v59, %v677_v58 }
  0xfd   : > { %v685_v4 = vpop.permute.xlu2 %684 }
  0xfe   : > { %v381_v52 = vpop.permute.xlu0 %380  ;;  %v687_v13 = vunpack.i.h.bf16 %v685_v4  ;;  %v686_v14 = vunpack.i.l.bf16 %v685_v4 }
  0xff   : > { %v384_v2 = vsel %vm382_vm7, %v677_v58, %v381_v52 }
 0x100   : > { %v670_v53 = vpop.permute.xlu1 %669  ;;  %v302_v20 = vsel %vm301_vm10, %v686_v14, %v687_v13 }
 0x101   : > { %v672_v56 = vunpack.i.h.bf16 %v670_v53  ;;  %v671_v57 = vunpack.i.l.bf16 %v670_v53 }
 0x103   : > { %v433_v60 = vsel %vm432_vm5, %v671_v57, %v672_v56  ;;  %v434_v61 = vsel %vm432_vm5, %v672_v56, %v431_v45 }
 0x104   : > { %469 = vmatpush.msra.mxu0 %v433_v60  ;;  %489 = vmatpush.msra.mxu1 %v434_v61 }
 0x105   : > { %v269_v27 = vpop.permute.xlu2 %268 }
 0x106   : > { %v300_v0 = vpop.permute.xlu0 %299  ;;  %470 = vmatpush.msra.mxu0 %v402_v62  ;;  %490 = vmatpush.msra.mxu1 %v403_v63 }
 0x107   : > { %v303_v21 = vsel %vm301_vm10, %v687_v13, %v300_v0 }
 0x108   : > { %v680_v6 = vpop.permute.xlu1 %679  ;;  %471 = vmatpush.msra.mxu0 %v383_v1  ;;  %491 = vmatpush.msra.mxu1 %v384_v2 }
 0x109   : > { %v682_v11 = vunpack.i.h.bf16 %v680_v6  ;;  %v681_v12 = vunpack.i.l.bf16 %v680_v6 }
 0x10b   : > { %v352_v15 = vsel %vm351_vm8, %v681_v12, %v682_v11  ;;  %v353_v16 = vsel %vm351_vm8, %v682_v11, %v350_v48 }
 0x10c   : > { %472 = vmatpush.msra.mxu0 %v352_v15  ;;  %492 = vmatpush.msra.mxu1 %v353_v16 }
 0x10e   : > { %473 = vmatpush.msra.mxu0 %v321_v17  ;;  %493 = vmatpush.msra.mxu1 %v322_v18  ;;  %v695_v19 = vpop.permute.xlu0 %694 }
 0x10f   : > { %v697_v22 = vunpack.i.h.bf16 %v695_v19  ;;  %v696_v23 = vunpack.i.l.bf16 %v695_v19 }
 0x110   : > { %474 = vmatpush.msra.mxu0 %v302_v20  ;;  %494 = vmatpush.msra.mxu1 %v303_v21  ;;  %v690_v24 = vpop.permute.xlu1 %689 }
 0x111   : > { %v692_v25 = vunpack.i.h.bf16 %v690_v24  ;;  %v691_v26 = vunpack.i.l.bf16 %v690_v24  ;;  %v237_v30 = vsel %vm236_vm12, %v696_v23, %v697_v22 }
 0x113   : > { %v271_v28 = vsel %vm270_vm11, %v691_v26, %v692_v25  ;;  %v272_v29 = vsel %vm270_vm11, %v692_v25, %v269_v27 }
 0x114   : > { %475 = vmatpush.msra.mxu0 %v271_v28  ;;  %495 = vmatpush.msra.mxu1 %v272_v29 }
 0x116   : > { %476 = vmatpush.msra.mxu0 %v237_v30 }
 0x118   : > { %v235_v33 = vpop.permute.xlu1 %234  ;;  %477 = vmatpush.msra.mxu0 %v220_v31 }
 0x119   : > { %v238_v35 = vsel %vm236_vm12, %v697_v22, %v235_v33  ;;  %626 = vmatmul.msk.f32.vlgmr.msra.gmra.mxu0 %vm458_vm13, %v439_v32 }
 0x11a   : > { %496 = vmatpush.msra.mxu1 %v238_v35 }
 0x11c   : > { %497 = vmatpush.msra.mxu1 %v221_v34 }
 0x11d   : > { %627 = vmatmul.msk.f32.vlgmr.msra.gmra.mxu1 %vm458_vm13, %v439_v32 }
 0x196   : > { %v479_v3 = vpop.f32.mrf.mxu0 }
 0x197   : > { %505 = vst [vmem:[%s504_s24] sm:$0xff] %v479_v3  ;;  %510 = sbr.rel (%p630_p4) target bundleno = 823 (0x337), region = 44 }
 0x19a   : > { %v499_v7 = vpop.f32.mrf.mxu1 }
 0x19b   : > { %506 = vst [vmem:[%s504_s24 + $0x8] sm:$0xff] %v499_v7 }
 0x19c   : > { %v725_v41 = vmov 512.0   ;;  %v726_v61 = vmov 0   ;;  %v542_v10 = vld [vmem:[%s862_s3] sm:$0xff] }
 0x19d   : > { %700 = vrcp.f32 %v725_v41  ;;  %698 = vset.pattern.permute.xlu1 %v726_v61  ;;  %699 = vset.pattern.permute.xlu0 %v726_v61  ;;  %v564_v14 = vld [vmem:[%s863_s4] sm:$0xff] }
 0x1a2   : > { %v511_v5 = vld [vmem:[%s864_s5] sm:$0xff]  ;;  %v512_v8 = vld [vmem:[%s864_s5 + $0x8] sm:$0xff]  ;;  %v513_v36 = vld [vmem:[%s864_s5 + $0x10] sm:$0xff] }
 0x1a3   : > { %v514_v37 = vld [vmem:[%s864_s5 + $0x18] sm:$0xff]  ;;  %v515_v38 = vadd.f32 %v513_v36, %v511_v5  ;;  %v701_v42 = vpop.eup %700 }
 0x1a4   : > { %v516_v39 = vadd.f32 %v514_v37, %v512_v8  ;;  %v521_v43 = vmul.f32 512.0, %v701_v42  ;;  %vm525_vm14 = vweird.f32 %v701_v42 }
 0x1a6   : > { %v517_v40 = vadd.f32 %v516_v39, %v515_v38  ;;  %v522_v44 = vsub.f32 1.0, %v521_v43 }
 0x1a8   : > { %518 = vadd.xlane.f32.xlu0 %v517_v40  ;;  %v523_v45 = vmul.f32 %v701_v42, %v522_v44 }
 0x1aa   : > { %v524_v46 = vadd.f32 %v701_v42, %v523_v45 }
 0x1ac   : > { %v526_v47 = vsel %vm525_vm14, %v701_v42, %v524_v46 }
 0x21b   : > { %v519_v48 = vpop.xlane.xlu0 %518 }
 0x21c   : > { %v527_v49 = vmul.f32 %v526_v47, %v519_v48 }
 0x21e   : > { %v528_v50 = vsub.f32 %v511_v5, %v527_v49  ;;  %v529_v51 = vsub.f32 %v512_v8, %v527_v49  ;;  %v530_v52 = vsub.f32 %v513_v36, %v527_v49  ;;  %v531_v53 = vsub.f32 %v514_v37, %v527_v49 }
 0x220   : > { %v532_v54 = vmul.f32 %v528_v50, %v528_v50  ;;  %v533_v55 = vmul.f32 %v529_v51, %v529_v51  ;;  %v534_v56 = vmul.f32 %v530_v52, %v530_v52  ;;  %v535_v57 = vmul.f32 %v531_v53, %v531_v53 }
 0x222   : > { %v536_v58 = vadd.f32 %v534_v56, %v532_v54  ;;  %v537_v59 = vadd.f32 %v535_v57, %v533_v55 }
 0x224   : > { %v538_v60 = vadd.f32 %v537_v59, %v536_v58 }
 0x226   : > { %539 = vadd.xlane.f32.xlu0 %v538_v60 }
 0x299   : > { %v540_v62 = vpop.xlane.xlu0 %539 }
 0x29a   : > { %v541_v63 = vmul.f32 %v540_v62, %v526_v47 }
 0x29c   : > { %v543_v0 = vadd.f32 1e-05, %v541_v63 }
 0x29e   : > { %702 = vrsqrt.f32 %v543_v0  ;;  %vm550_vm0 = vweird.f32 %v543_v0 }
 0x2a4   : > { %v703_v1 = vpop.eup %702 }
 0x2a5   : > { %v545_v2 = vmul.f32 %v703_v1, %v543_v0  ;;  %vm551_vm15 = vweird.f32 %v703_v1 }
 0x2a6   : > { %vm552_vm1 = vmor %vm550_vm0, %vm551_vm15 }
 0x2a7   : > { %v546_v4 = vmul.f32 %v703_v1, %v545_v2 }
 0x2a9   : > { %v547_v6 = vmul.f32 0.5, %v546_v4 }
 0x2ab   : > { %v548_v9 = vsub.f32 1.5, %v547_v6 }
 0x2ad   : > { %v549_v11 = vmul.f32 %v703_v1, %v548_v9 }
 0x2af   : > { %v553_v12 = vsel %vm552_vm1, %v703_v1, %v549_v11 }
 0x2b0   : > { %v554_v13 = vmul.f32 %v553_v12, %v542_v10 }
 0x2b2   : > { %557 = vperm.xlu1 %698, %v554_v13  }
 0x2ba   : > { %567 = vperm.xlu1 %698, %v564_v14  }
 0x324   : > { %v558_v15 = vpop.permute.xlu1 %557 }
 0x325   : > { %v560_v16 = vmul.f32 %v558_v15, %v528_v50  ;;  %v561_v17 = vmul.f32 %v558_v15, %v529_v51  ;;  %v562_v18 = vmul.f32 %v558_v15, %v530_v52  ;;  %v563_v19 = vmul.f32 %v558_v15, %v531_v53 }
 0x32c   : > { %v568_v20 = vpop.permute.xlu1 %567 }
 0x32d   : > { %v570_v21 = vadd.f32 %v568_v20, %v560_v16  ;;  %v571_v22 = vadd.f32 %v568_v20, %v561_v17  ;;  %v572_v23 = vadd.f32 %v568_v20, %v562_v18  ;;  %v573_v24 = vadd.f32 %v568_v20, %v563_v19 }
 0x32f   : > { %vm574_vm2 = vcmp.gt.f32.partialorder %v570_v21, 0.0  ;;  %vm575_vm3 = vcmp.gt.f32.partialorder %v571_v22, 0.0  ;;  %vm576_vm4 = vcmp.gt.f32.partialorder %v572_v23, 0.0  ;;  %vm577_vm5 = vcmp.gt.f32.partialorder %v573_v24, 0.0 }
 0x330   : > { %v578_v25 = vmul.f32 0.01, %v570_v21  ;;  %v579_v26 = vmul.f32 0.01, %v571_v22  ;;  %v580_v27 = vmul.f32 0.01, %v572_v23 }
 0x331   : > { %v581_v28 = vmul.f32 0.01, %v573_v24 }
 0x332   : > { %v582_v29 = vsel %vm574_vm2, %v570_v21, %v578_v25  ;;  %v583_v30 = vsel %vm575_vm3, %v571_v22, %v579_v26  ;;  %v584_v31 = vsel %vm576_vm4, %v572_v23, %v580_v27 }
 0x333   : > { %v585_v32 = vsel %vm577_vm5, %v573_v24, %v581_v28  ;;  %586 = vst [vmem:[%s864_s5] sm:$0xff] %v582_v29 }
 0x334   : > { %587 = vst [vmem:[%s864_s5 + $0x8] sm:$0xff] %v583_v30 }
 0x335   : > { %588 = vst [vmem:[%s864_s5 + $0x10] sm:$0xff] %v584_v31 }
 0x336   : > { %589 = vst [vmem:[%s864_s5 + $0x18] sm:$0xff] %v585_v32 }
 0x337 PF: > { %s15_s18 = sadd.s32 1, %s710_s18  }
 0x338   : > { %p12_p5 = scmp.ge.s32.totalorder %s15_s18, 4  }
 0x33a   :  { %14 = sbr.rel (!%p12_p5) target bundleno = 1 (0x1), region = 72 }

</bundles_post_ra>
